<compile_context>
chip_gen: v7x
topology: tpu7x:2x2x1
jax: 0.10.0
libtpu: 0.0.40
codegen_flags: <defaults>
</compile_context>

<pallas_src>
import jax
import jax.numpy as jnp
from jax.experimental import pallas as pl
from jax.experimental.pallas import tpu as pltpu

_NEG = -1e30


def _ner_head_kernel(h_ref, w1_ref, b1_ref, w2_ref, b2_ref, cmask_ref,
                     lab_ref, logits_ref, tot_ref, cnt_ref):
    # ----- MLP head: relu(fc1) -> relu(fc2); bf16 MXU, f32 accumulation -----
    h = h_ref[...].astype(jnp.bfloat16)                       # (TN, H)
    x = jnp.dot(h, w1_ref[...],
                preferred_element_type=jnp.float32)           # (TN, 512) f32
    x = jnp.maximum(x + b1_ref[...], 0.0)
    x = x.astype(jnp.bfloat16)                                # bf16 fc2 operand
    logits = jnp.dot(x, w2_ref[...],
                     preferred_element_type=jnp.float32)      # (TN, T_pad) f32
    logits = jnp.maximum(logits + b2_ref[...], 0.0)
    logits_ref[...] = logits.astype(logits_ref.dtype)         # bf16 lane-dense

    # ----- CrossEntropy(ignore_index=-1) partial sums for this tile ---------
    labels = lab_ref[...]                                     # (TN, 1) int32
    tn, t_pad = logits.shape
    # Padded class columns carry -1e30 in cmask -> excluded from the softmax.
    masked = logits + cmask_ref[...]                          # (TN, T_pad)
    m = jnp.max(masked, axis=-1, keepdims=True)               # (TN, 1)
    lse = m + jnp.log(jnp.sum(jnp.exp(masked - m), axis=-1, keepdims=True))
    col = jax.lax.broadcasted_iota(jnp.int32, (1, t_pad), 1)  # (1, T_pad)
    picked = jnp.sum(jnp.where(col == labels, logits, 0.0),
                     axis=-1, keepdims=True)                  # (TN, 1)
    valid = labels != -1                                      # ragged/pad rows
    per_row = jnp.where(valid, lse - picked, 0.0)             # are labeled -1

    tile_total = jnp.sum(per_row, axis=0, keepdims=True)                # (1,1)
    tile_count = jnp.sum(valid.astype(jnp.float32), axis=0, keepdims=True)
    tot_ref[...] = jnp.broadcast_to(tile_total, (1, 1, 128))
    cnt_ref[...] = jnp.broadcast_to(tile_count, (1, 1, 128))


def ner_head(last_hidden, w1, b1, w2, b2, labels, *, tile_n=1024):
    """last_hidden: (B, S, H) f32; labels: (B, S) int with -1 = ignore.

    Returns (loss: (), logits: (B, S, T)) mirroring NERModel.forward with
    `label is not None`.
    """
    B, S, H = last_hidden.shape
    FC1 = w1.shape[1]
    T = w2.shape[1]
    N = B * S

    T_pad = 128 * pl.cdiv(T, 128)          # lane-dense class dimension
    num_tiles = pl.cdiv(N, tile_n)         # ragged last tile allowed

    # No cast / no row-pad of the activation stream (avoids an extra HBM pass);
    # the bf16 cast happens in-kernel. Only the tiny labels array is padded
    # (with -1) so out-of-bounds rows of the ragged last tile never count.
    h2d = last_hidden.reshape(N, H)
    lab2d = labels.reshape(N, 1).astype(jnp.int32)
    lab2d = jnp.pad(lab2d, ((0, num_tiles * tile_n - N), (0, 0)),
                    constant_values=-1)

    # Resident weights: bf16 for both MXU operands; biases stay f32.
    w1c = w1.astype(jnp.bfloat16)
    w2p = jnp.pad(w2, ((0, 0), (0, T_pad - T))).astype(jnp.bfloat16)
    b1p = b1.reshape(1, -1).astype(jnp.float32)
    b2p = jnp.pad(b2.reshape(1, -1).astype(jnp.float32),
                  ((0, 0), (0, T_pad - T)))
    # Additive softmax mask for padded class columns.
    cmask = jnp.where(jnp.arange(T_pad) < T, 0.0, _NEG).reshape(1, T_pad)
    cmask = cmask.astype(jnp.float32)

    flops = 2 * N * H * FC1 + 2 * N * FC1 * T_pad
    bytes_accessed = (N * H * 4                     # h stream (f32 read)
                      + H * FC1 * 2                 # w1 bf16
                      + FC1 * T_pad * 2             # w2 bf16
                      + (FC1 + 2 * T_pad) * 4       # biases + mask
                      + num_tiles * tile_n * 4      # labels
                      + N * T_pad * 2               # logits out (bf16)
                      + num_tiles * 2 * 128 * 4)    # loss partials
    cost = pl.CostEstimate(flops=flops,
                           transcendentals=N * T_pad,
                           bytes_accessed=bytes_accessed)

    logits_pad, tot, cnt = pl.pallas_call(
        _ner_head_kernel,
        out_shape=(
            jax.ShapeDtypeStruct((N, T_pad), jnp.bfloat16),
            jax.ShapeDtypeStruct((num_tiles, 1, 128), jnp.float32),
            jax.ShapeDtypeStruct((num_tiles, 1, 128), jnp.float32),
        ),
        grid=(num_tiles,),
        in_specs=[
            pl.BlockSpec((tile_n, H), lambda i: (i, 0)),       # h tile (ragged ok)
            pl.BlockSpec((H, FC1), lambda i: (0, 0)),          # w1 (resident)
            pl.BlockSpec((1, FC1), lambda i: (0, 0)),          # b1
            pl.BlockSpec((FC1, T_pad), lambda i: (0, 0)),      # w2 (padded)
            pl.BlockSpec((1, T_pad), lambda i: (0, 0)),        # b2 (padded)
            pl.BlockSpec((1, T_pad), lambda i: (0, 0)),        # class mask
            pl.BlockSpec((tile_n, 1), lambda i: (i, 0)),       # labels tile
        ],
        out_specs=(
            pl.BlockSpec((tile_n, T_pad), lambda i: (i, 0)),   # logits tile
            pl.BlockSpec((1, 1, 128), lambda i: (i, 0, 0)),    # per-tile total
            pl.BlockSpec((1, 1, 128), lambda i: (i, 0, 0)),    # per-tile count
        ),
        compiler_params=pltpu.CompilerParams(
            dimension_semantics=("parallel",),                 # megacore-safe
            vmem_limit_bytes=32 * 1024 * 1024,
        ),
        cost_estimate=cost,
    )(h2d, w1c, b1p, w2p, b2p, cmask, lab2d)

    total = jnp.sum(tot[:, 0, 0])
    count = jnp.sum(cnt[:, 0, 0])
    loss = total / jnp.maximum(count, 1.0)
    logits = logits_pad[:, :T].astype(jnp.float32).reshape(B, S, T)
    return loss, logits


def _reference(last_hidden, w1, b1, w2, b2, labels):
    x = jnp.maximum(last_hidden @ w1 + b1, 0.0)
    logits = jnp.maximum(x @ w2 + b2, 0.0)
    flat = logits.reshape(-1, logits.shape[-1])
    lab = labels.reshape(-1)
    lse = jax.nn.logsumexp(flat, axis=-1)
    picked = jnp.take_along_axis(
        flat, jnp.clip(lab, 0, None)[:, None], axis=-1)[:, 0]
    valid = (lab != -1).astype(jnp.float32)
    loss = jnp.sum((lse - picked) * valid) / jnp.maximum(jnp.sum(valid), 1.0)
    return loss, logits


if __name__ == "__main__":
    key = jax.random.PRNGKey(0)
    k_h, k_w1, k_b1, k_w2, k_b2, k_lab = jax.random.split(key, 6)

    # Small stand-in shapes: N = B*S = 300 with tile_n=128 -> 3 tiles, the last
    # one ragged (44 rows), exercising the parallel per-tile partials and the
    # ragged/padded-label path. Default tile_n for real sizes is 1024.
    B, S, H = 3, 100, 128        # small "bert.config.hidden_size" = 128
    FC1 = 512
    NUM_LABELS = 9               # len(ne_dict)

    # Stand-in for bert(...)['last_hidden_state'].
    last_hidden = jax.random.normal(k_h, (B, S, H), dtype=jnp.float32)

    # Deterministic Linear params (PyTorch stores weight as (out, in);
    # we keep the transposed (in, out) layout for the kernel).
    bound1 = 1.0 / jnp.sqrt(jnp.float32(H))
    w1 = jax.random.uniform(k_w1, (H, FC1), jnp.float32, -bound1, bound1)
    b1 = jax.random.uniform(k_b1, (FC1,), jnp.float32, -bound1, bound1)
    bound2 = 1.0 / jnp.sqrt(jnp.float32(FC1))
    w2 = jax.random.uniform(k_w2, (FC1, NUM_LABELS), jnp.float32, -bound2, bound2)
    b2 = jax.random.uniform(k_b2, (NUM_LABELS,), jnp.float32, -bound2, bound2)

    # Labels in [-1, NUM_LABELS); -1 positions are ignored by the loss.
    labels = jax.random.randint(k_lab, (B, S), -1, NUM_LABELS, dtype=jnp.int32)

    loss, logits = ner_head(last_hidden, w1, b1, w2, b2, labels, tile_n=128)
    jax.block_until_ready((loss, logits))

    ref_loss, ref_logits = _reference(last_hidden, w1, b1, w2, b2, labels)
    # bf16 matmuls + bf16 logits writeback vs f32 reference -> relaxed tolerances.
    assert jnp.allclose(logits, ref_logits, atol=3e-2, rtol=3e-2)
    assert jnp.allclose(loss, ref_loss, atol=3e-2, rtol=3e-2)

    print("KERNEL_OK")
</pallas_src>

<mosaic_0001>
module attributes {stable_mosaic.version = 11 : i64} {
  func.func @_ner_head_kernel(%arg0: i32, %arg1: memref<128x128xf32, #tpu.memory_space<vmem>>, %arg2: memref<128x512xbf16, #tpu.memory_space<vmem>>, %arg3: memref<1x512xf32, #tpu.memory_space<vmem>>, %arg4: memref<512x128xbf16, #tpu.memory_space<vmem>>, %arg5: memref<1x128xf32, #tpu.memory_space<vmem>>, %arg6: memref<1x128xf32, #tpu.memory_space<vmem>>, %arg7: memref<128x1xi32, #tpu.memory_space<vmem>>, %arg8: memref<128x128xbf16, #tpu.memory_space<vmem>>, %arg9: memref<1x1x128xf32, #tpu.memory_space<vmem>>, %arg10: memref<1x1x128xf32, #tpu.memory_space<vmem>>) attributes {dimension_semantics = [#tpu.dimension_semantics<parallel>], iteration_bounds = array<i64: 3>, scalar_prefetch = 0 : i64, scratch_operands = 0 : i64, tpu.core_type = #tpu.core_type<tc>, window_params = [{transform_indices = @transform_0, window_bounds = array<i64: 128, 128>}, {pipeline_mode = #tpu.pipeline_mode<synchronous>, transform_indices = @transform_1, window_bounds = array<i64: 128, 512>}, {pipeline_mode = #tpu.pipeline_mode<synchronous>, transform_indices = @transform_2, window_bounds = array<i64: 1, 512>}, {pipeline_mode = #tpu.pipeline_mode<synchronous>, transform_indices = @transform_3, window_bounds = array<i64: 512, 128>}, {pipeline_mode = #tpu.pipeline_mode<synchronous>, transform_indices = @transform_4, window_bounds = array<i64: 1, 128>}, {pipeline_mode = #tpu.pipeline_mode<synchronous>, transform_indices = @transform_5, window_bounds = array<i64: 1, 128>}, {transform_indices = @transform_6, window_bounds = array<i64: 128, 1>}, {transform_indices = @transform_7, window_bounds = array<i64: 128, 128>}, {transform_indices = @transform_8, window_bounds = array<i64: 1, 1, 128>}, {transform_indices = @transform_9, window_bounds = array<i64: 1, 1, 128>}]} {
    %c0 = arith.constant 0 : index
    %c0_0 = arith.constant 0 : index
    %0 = vector.load %arg1[%c0, %c0_0] : memref<128x128xf32, #tpu.memory_space<vmem>>, vector<128x128xf32>
    %1 = arith.truncf %0 : vector<128x128xf32> to vector<128x128xbf16>
    %c0_1 = arith.constant 0 : index
    %c0_2 = arith.constant 0 : index
    %2 = vector.load %arg2[%c0_1, %c0_2] : memref<128x512xbf16, #tpu.memory_space<vmem>>, vector<128x512xbf16>
    %cst = arith.constant dense<0.000000e+00> : vector<128x512xf32>
    %3 = tpu.matmul %1, %2, %cst {dimension_numbers = #tpu.dot_dimension_numbers<[1], [0], [0], [1], [0, 0, 1, 1], [], []>} : vector<128x128xbf16>, vector<128x512xbf16>, vector<128x512xf32> -> vector<128x512xf32>
    %c0_3 = arith.constant 0 : index
    %c0_4 = arith.constant 0 : index
    %4 = vector.load %arg3[%c0_3, %c0_4] : memref<1x512xf32, #tpu.memory_space<vmem>>, vector<1x512xf32>
    %5 = vector.broadcast %4 : vector<1x512xf32> to vector<128x512xf32>
    %6 = arith.addf %3, %5 : vector<128x512xf32>
    %cst_5 = arith.constant 0.000000e+00 : f32
    %7 = vector.broadcast %cst_5 : f32 to vector<128x512xf32>
    %8 = arith.maximumf %6, %7 : vector<128x512xf32>
    %9 = arith.truncf %8 : vector<128x512xf32> to vector<128x512xbf16>
    %c0_6 = arith.constant 0 : index
    %c0_7 = arith.constant 0 : index
    %10 = vector.load %arg4[%c0_6, %c0_7] : memref<512x128xbf16, #tpu.memory_space<vmem>>, vector<512x128xbf16>
    %cst_8 = arith.constant dense<0.000000e+00> : vector<128x128xf32>
    %11 = tpu.matmul %9, %10, %cst_8 {dimension_numbers = #tpu.dot_dimension_numbers<[1], [0], [0], [1], [0, 0, 1, 1], [], []>} : vector<128x512xbf16>, vector<512x128xbf16>, vector<128x128xf32> -> vector<128x128xf32>
    %c0_9 = arith.constant 0 : index
    %c0_10 = arith.constant 0 : index
    %12 = vector.load %arg5[%c0_9, %c0_10] : memref<1x128xf32, #tpu.memory_space<vmem>>, vector<1x128xf32>
    %13 = vector.broadcast %12 : vector<1x128xf32> to vector<128x128xf32>
    %14 = arith.addf %11, %13 : vector<128x128xf32>
    %cst_11 = arith.constant 0.000000e+00 : f32
    %15 = vector.broadcast %cst_11 : f32 to vector<128x128xf32>
    %16 = arith.maximumf %14, %15 : vector<128x128xf32>
    %17 = arith.truncf %16 : vector<128x128xf32> to vector<128x128xbf16>
    %c0_12 = arith.constant 0 : index
    %c0_13 = arith.constant 0 : index
    %18 = vector.load %arg8[%c0_12, %c0_13] : memref<128x128xbf16, #tpu.memory_space<vmem>>, vector<128x128xbf16>
    tpu.vector_store %arg8[%c0_12, %c0_13], %17 {strides = array<i32>} : memref<128x128xbf16, #tpu.memory_space<vmem>>, vector<128x128xbf16>,
    %c0_14 = arith.constant 0 : index
    %c0_15 = arith.constant 0 : index
    %19 = vector.load %arg7[%c0_14, %c0_15] : memref<128x1xi32, #tpu.memory_space<vmem>>, vector<128x1xi32>
    %c0_16 = arith.constant 0 : index
    %c0_17 = arith.constant 0 : index
    %20 = vector.load %arg6[%c0_16, %c0_17] : memref<1x128xf32, #tpu.memory_space<vmem>>, vector<1x128xf32>
    %21 = vector.broadcast %20 : vector<1x128xf32> to vector<128x128xf32>
    %22 = arith.addf %16, %21 : vector<128x128xf32>
    %cst_18 = arith.constant dense<0xFF800000> : vector<128xf32>
    %23 = vector.multi_reduction <maximumf>, %22, %cst_18 [1] : vector<128x128xf32> to vector<128xf32>
    %24 = vector.shape_cast %23 : vector<128xf32> to vector<128x1xf32>
    %25 = vector.broadcast %24 : vector<128x1xf32> to vector<128x128xf32>
    %26 = arith.subf %22, %25 : vector<128x128xf32>
    %27 = math.exp %26 : vector<128x128xf32>
    %cst_19 = arith.constant dense<0.000000e+00> : vector<128xf32>
    %28 = vector.multi_reduction <add>, %27, %cst_19 [1] : vector<128x128xf32> to vector<128xf32>
    %29 = vector.shape_cast %28 : vector<128xf32> to vector<128x1xf32>
    %30 = math.log %29 : vector<128x1xf32>
    %31 = arith.addf %24, %30 : vector<128x1xf32>
    %32 = tpu.iota {dimensions = array<i32: 1>} : vector<1x128xi32>
    %33 = vector.broadcast %32 : vector<1x128xi32> to vector<128x128xi32>
    %34 = vector.broadcast %19 : vector<128x1xi32> to vector<128x128xi32>
    %35 = arith.cmpi eq, %33, %34 : vector<128x128xi32>
    %cst_20 = arith.constant 0.000000e+00 : f32
    %36 = vector.broadcast %cst_20 : f32 to vector<128x128xf32>
    %37 = arith.select %35, %16, %36 : vector<128x128xi1>, vector<128x128xf32>
    %cst_21 = arith.constant dense<0.000000e+00> : vector<128xf32>
    %38 = vector.multi_reduction <add>, %37, %cst_21 [1] : vector<128x128xf32> to vector<128xf32>
    %39 = vector.shape_cast %38 : vector<128xf32> to vector<128x1xf32>
    %c-1_i32 = arith.constant -1 : i32
    %40 = vector.broadcast %c-1_i32 : i32 to vector<128x1xi32>
    %41 = arith.cmpi ne, %19, %40 : vector<128x1xi32>
    %42 = arith.subf %31, %39 : vector<128x1xf32>
    %cst_22 = arith.constant 0.000000e+00 : f32
    %43 = vector.broadcast %cst_22 : f32 to vector<128x1xf32>
    %44 = arith.select %41, %42, %43 : vector<128x1xi1>, vector<128x1xf32>
    %cst_23 = arith.constant dense<0.000000e+00> : vector<1xf32>
    %45 = vector.multi_reduction <add>, %44, %cst_23 [0] : vector<128x1xf32> to vector<1xf32>
    %46 = vector.shape_cast %45 : vector<1xf32> to vector<1x1xf32>
    %47 = arith.extui %41 : vector<128x1xi1> to vector<128x1xi32>
    %48 = arith.sitofp %47 : vector<128x1xi32> to vector<128x1xf32>
    %cst_24 = arith.constant dense<0.000000e+00> : vector<1xf32>
    %49 = vector.multi_reduction <add>, %48, %cst_24 [0] : vector<128x1xf32> to vector<1xf32>
    %50 = vector.shape_cast %49 : vector<1xf32> to vector<1x1xf32>
    %51 = vector.shape_cast %46 : vector<1x1xf32> to vector<1x1x1xf32>
    %52 = vector.broadcast %51 : vector<1x1x1xf32> to vector<1x1x128xf32>
    %c0_25 = arith.constant 0 : index
    %c0_26 = arith.constant 0 : index
    %c0_27 = arith.constant 0 : index
    %53 = vector.load %arg9[%c0_25, %c0_26, %c0_27] : memref<1x1x128xf32, #tpu.memory_space<vmem>>, vector<1x1x128xf32>
    tpu.vector_store %arg9[%c0_25, %c0_26, %c0_27], %52 {strides = array<i32>} : memref<1x1x128xf32, #tpu.memory_space<vmem>>, vector<1x1x128xf32>,
    %54 = vector.shape_cast %50 : vector<1x1xf32> to vector<1x1x1xf32>
    %55 = vector.broadcast %54 : vector<1x1x1xf32> to vector<1x1x128xf32>
    %c0_28 = arith.constant 0 : index
    %c0_29 = arith.constant 0 : index
    %c0_30 = arith.constant 0 : index
    %56 = vector.load %arg10[%c0_28, %c0_29, %c0_30] : memref<1x1x128xf32, #tpu.memory_space<vmem>>, vector<1x1x128xf32>
    tpu.vector_store %arg10[%c0_28, %c0_29, %c0_30], %55 {strides = array<i32>} : memref<1x1x128xf32, #tpu.memory_space<vmem>>, vector<1x1x128xf32>,
    return
  }
  func.func @transform_0(%arg0: i32) -> (i32, i32) {
    %c0_i32 = arith.constant 0 : i32
    %c0_i32_0 = arith.constant 0 : i32
    return %arg0, %c0_i32 : i32, i32
  }
  func.func @transform_1(%arg0: i32) -> (i32, i32) {
    %c0_i32 = arith.constant 0 : i32
    %c0_i32_0 = arith.constant 0 : i32
    %c0_i32_1 = arith.constant 0 : i32
    return %c0_i32, %c0_i32_0 : i32, i32
  }
  func.func @transform_2(%arg0: i32) -> (i32, i32) {
    %c0_i32 = arith.constant 0 : i32
    %c0_i32_0 = arith.constant 0 : i32
    %c0_i32_1 = arith.constant 0 : i32
    return %c0_i32, %c0_i32_0 : i32, i32
  }
  func.func @transform_3(%arg0: i32) -> (i32, i32) {
    %c0_i32 = arith.constant 0 : i32
    %c0_i32_0 = arith.constant 0 : i32
    %c0_i32_1 = arith.constant 0 : i32
    return %c0_i32, %c0_i32_0 : i32, i32
  }
  func.func @transform_4(%arg0: i32) -> (i32, i32) {
    %c0_i32 = arith.constant 0 : i32
    %c0_i32_0 = arith.constant 0 : i32
    %c0_i32_1 = arith.constant 0 : i32
    return %c0_i32, %c0_i32_0 : i32, i32
  }
  func.func @transform_5(%arg0: i32) -> (i32, i32) {
    %c0_i32 = arith.constant 0 : i32
    %c0_i32_0 = arith.constant 0 : i32
    %c0_i32_1 = arith.constant 0 : i32
    return %c0_i32, %c0_i32_0 : i32, i32
  }
  func.func @transform_6(%arg0: i32) -> (i32, i32) {
    %c0_i32 = arith.constant 0 : i32
    %c0_i32_0 = arith.constant 0 : i32
    return %arg0, %c0_i32 : i32, i32
  }
  func.func @transform_7(%arg0: i32) -> (i32, i32) {
    %c0_i32 = arith.constant 0 : i32
    %c0_i32_0 = arith.constant 0 : i32
    return %arg0, %c0_i32 : i32, i32
  }
  func.func @transform_8(%arg0: i32) -> (i32, i32, i32) {
    %c0_i32 = arith.constant 0 : i32
    %c0_i32_0 = arith.constant 0 : i32
    %c0_i32_1 = arith.constant 0 : i32
    return %arg0, %c0_i32, %c0_i32_0 : i32, i32, i32
  }
  func.func @transform_9(%arg0: i32) -> (i32, i32, i32) {
    %c0_i32 = arith.constant 0 : i32
    %c0_i32_0 = arith.constant 0 : i32
    %c0_i32_1 = arith.constant 0 : i32
    return %arg0, %c0_i32, %c0_i32_0 : i32, i32, i32
  }
}

</mosaic_0001>

<bundles_post_ra>
// kernel: tpu_custom_call.1
= control target key start
LH: loop header
LB: loop body
LE: loop exit
PB: predicated region body
PF: predicated region fallthrough
CT: control target
= control target key end

     0   :  { %s3888_s0 = inlined_call_operand.vmem [shape: f32[300,128], index: 0, kind: input, shape index: {}]   ;;  %s3889_s1 = inlined_call_operand.hbm [shape: bf16[128,512], index: 1, kind: input, shape index: {}]   ;;  %s3890_s2 = inlined_call_operand.vmem [shape: f32[1,512], index: 2, kind: input, shape index: {}]   ;;  %s3891_s3 = inlined_call_operand.hbm [shape: bf16[512,128], index: 3, kind: input, shape index: {}]   ;;  %s3892_s4 = inlined_call_operand.vmem [shape: f32[1,128], index: 4, kind: input, shape index: {}]   ;;  %s3893_s5 = inlined_call_operand.vmem [shape: f32[1,128], index: 5, kind: input, shape index: {}]   ;;  %s3894_s6 = inlined_call_operand.vmem [shape: s32[384,1], index: 6, kind: input, shape index: {}]   ;;  %s3895_s7 = inlined_call_operand.hbm [shape: bf16[300,128], index: 7, kind: output, shape index: {0}]   ;;  %s3896_s8 = inlined_call_operand.hbm [shape: f32[3,1,128], index: 8, kind: output, shape index: {1}]   ;;  %s3897_s9 = inlined_call_operand.hbm [shape: f32[3,1,128], index: 9, kind: output, shape index: {2}]  }
   0x1   :  { %3910 = sst [smem:[#allocation18_spill]] %s3888_s0 }
   0x2   :  { %3911 = sst [smem:[#allocation19_spill]] %s3889_s1 }
   0x3   :  { %15 = vsyncpa [#allocation3], 0 }
   0x4   :  { %16 = vsyncpa [#allocation6], 0 }
   0x5   :  { %17 = vsyncpa [#allocation4], 0 }
   0x6   :  { %19 = vsyncpa [#allocation4 + $0x1], 0 }
   0x7   :  { %20 = vsyncpa [#allocation9], 0 }
   0x8   :  { %22 = vsyncpa [#allocation9 + $0x1], 0  ;;  %s3025_s30 = smov 0   ;;  %s3027_s10 = smov 0  }
   0x9   :  { %s3029_s11 = smov 0   ;;  %s3031_s12 = smov 0  }
   0xa LB: > { %3912 = sst [smem:[#allocation15_spill]] %s2956_s11  ;;  %s3046_s13 = sadd.s32 4294967295, %s2960_s12   ;;  %s2960_s12 = sphi %s3031_s12, %s3935_s12   ;;  %s2956_s11 = sphi %s3029_s11, %s3937_s11   ;;  %s2952_s10 = sphi %s3027_s10, %s3939_s10   ;;  %s2948_s30 = sphi %s3025_s30, %s3938_s30  }
   0xb   : > { %s3898_s14 = sadd.s32 4294967294, %s2960_s12   ;;  %s3050_s15 = sadd.s32 1, %s2960_s12  }
   0xc   : > { %3913 = sst [smem:[#allocation16_spill]] %s3050_s15  ;;  %s192_s16 = sadd.s32 1, %s2956_s11 }
   0xd   : > { %s189_s17 = ssub.s32 %s2960_s12, %s3050_s15  ;;  %p202_p0 = scmp.ne.s32.totalorder %s2956_s11, %s2952_s10 }
   0xe   : > { %p190_p1 = scmp.eq.s32.totalorder %s189_s17, 0  ;;  %p203_p2 = scmp.eq.s32.totalorder %s3046_s13, 2 }
   0xf   : > { %p208_p3 = scmp.ne.s32.totalorder %s2952_s10, %s2948_s30  ;;  %p209_p4 = scmp.eq.s32.totalorder %s3898_s14, 2 }
  0x10   : > { %s3063_s18 = scalar_select %p190_p1, %s2956_s11, %s192_s16  }
  0x11   : > { %p3065_p5 = por %p203_p2, %p202_p0  ;;  %p3069_p6 = por %p209_p4, %p208_p3 }
  0x12   : > { %3914 = sst [smem:[#allocation17_spill]] %s3063_s18  ;;  %p2224_p7 = scmp.ge.s32.totalorder %s2960_s12, 1 }
  0x13   : > { %s3915_s19 = scalar_select %p3065_p5, 1, 0 }
  0x14   : > { %s3916_s20 = scalar_select %p3069_p6, 1, 0 }
  0x15   : > { %p268_p8 = scmp.lt.s32.totalorder %s2960_s12, 4  ;;  %p3899_p9 = scmp.eq.s32.totalorder %s3046_s13, 0 }
  0x16   : > { %s2962_s22 = smov [#allocation2]   ;;  %s2963_s25 = smov [#allocation5]  }
  0x17   : > { %p3076_p10 = pnand %p2224_p7, %p268_p8  ;;  %s280_s23 = sshll.u32 %s2962_s22, 4  ;;  %s281_s23 = int_to_ptr.vmem [resolvable:$true] %s280_s23 }
  0x18   : > { %s296_s26 = sshll.u32 %s2963_s25, 4  ;;  %s3919_s1 = sld [smem:[#allocation19_spill]]  ;;  %s3088_s26 = int_to_ptr.vmem [resolvable:$true] %s296_s26 }
  0x19   : > { %s3917_s21 = scalar_select %p3076_p10, 1, 0 }
  0x1a   : > { %p2550_p11 = pneg %p3076_p10 }
  0x1c   : > { %p3084_p12 = pnand %p3899_p9, %p2550_p11 }
  0x1e   : > { %s2774_s29 = scalar_lea.hbm %s3919_s1, 4096  ;;  %p2776_p0 = pneg %p3084_p12 }
  0x1f   : > { %p2775_p13 = scmp.ne.s32.totalorder %s3919_s1, %s2774_s29  ;;  %p2781_p3 = scmp.lt.u32.totalorder %s2774_s29, %s3919_s1 }
  0x21   : > { %p2777_p1 = pnand %p2776_p0, %p2775_p13 }
  0x23   : > { %p2778_p2 = pneg %p2777_p1 }
  0x25   : > { %p2783_p4 = pnand %p2781_p3, %p2778_p2 }
  0x27   : > { %2786 = shalt.err (!%p2783_p4)
}
  0x28   : > { %s2787_s25 = scalar_lea.vmem %s281_s23, 4096  ;;  %p2795_p9 = scmp.lt.s32.totalorder %s281_s23, %s281_s23 }
  0x29   : > { %p2788_p7 = scmp.ne.s32.totalorder %s281_s23, %s2787_s25  ;;  %p2796_p6 = scmp.lt.s32.totalorder %s2787_s25, %s2787_s25 }
  0x2b   : > { %p2790_p8 = pnand %p2788_p7, %p2776_p0  ;;  %p2797_p5 = por %p2796_p6, %p2795_p9 }
  0x2d   : > { %p2791_p11 = pneg %p2790_p8 }
  0x2f   : > { %p2798_p10 = pnand %p2797_p5, %p2791_p11 }
  0x31   : > { %2801 = shalt.err (!%p2798_p10)
}
  0x32   : > { %s2964_s27 = smov 256   ;;  %s2965_s28 = smov 16  }
  0x33   : > { %2553 = dma.hbm_to_vmem [thread:$0]  (!%p3084_p12), %s3919_s1, 4096, %s281_s23, [#allocation3], %s2964_s27, %s2964_s27, %s2965_s28  }
  0x34   : > { %s2802_s22 = scalar_lea.hbm %s3891_s3, 4096 }
  0x35   : > { %p2803_p13 = scmp.ne.s32.totalorder %s3891_s3, %s2802_s22  ;;  %p2809_p9 = scmp.lt.u32.totalorder %s2802_s22, %s3891_s3 }
  0x37   : > { %p2805_p5 = pnand %p2803_p13, %p2776_p0 }
  0x39   : > { %p2806_p6 = pneg %p2805_p5 }
  0x3b   : > { %p2811_p10 = pnand %p2809_p9, %p2806_p6 }
  0x3d   : > { %2814 = shalt.err (!%p2811_p10)
}
  0x3e   : > { %s2815_s23 = scalar_lea.vmem %s3088_s26, 4096  ;;  %p2823_p4 = scmp.lt.s32.totalorder %s3088_s26, %s3088_s26 }
  0x3f   : > { %p2816_p1 = scmp.ne.s32.totalorder %s3088_s26, %s2815_s23  ;;  %p2824_p7 = scmp.lt.s32.totalorder %s2815_s23, %s2815_s23 }
  0x41   : > { %p2818_p2 = pnand %p2816_p1, %p2776_p0  ;;  %p2825_p8 = por %p2824_p7, %p2823_p4 }
  0x43   : > { %p2819_p3 = pneg %p2818_p2 }
  0x45   : > { %p2826_p11 = pnand %p2825_p8, %p2819_p3 }
  0x47   : > { %2829 = shalt.err (!%p2826_p11)
}
  0x48   : > { %s2966_s11 = smov 64   ;;  %s2967_s15 = smov 4  }
  0x49   : > { %2556 = dma.hbm_to_vmem [thread:$0]  (!%p3084_p12), %s3891_s3, 4096, %s3088_s26, [#allocation6], %s2966_s11, %s2966_s11, %s2967_s15  }
  0x4a   : > { %p3920_p13 = scmp.ne.s32.totalorder %s3917_s21, 0 }
  0x4b   : > { %p3921_p0 = scmp.eq.s32.totalorder (!%p3920_p13), %s3046_s13, 0 }
  0x4c   : > { %344 = sbr.rel (%p3920_p13) target bundleno = 1166 (0x48e), region = 48 }
  0x53   : > { %2931 = dma.done.wait (%p3921_p0), [#allocation3], 4096   ;;  %p3922_p5 = pmov %p3921_p0 }
  0x54   : > { %p3923_p6 = pmov %p3921_p0 }
  0x55   : > { %2933 = vsyncadd (%p3922_p5), [#allocation3], 4294963200 }
  0x56   : > { %2935 = dma.done.wait (%p3923_p6), [#allocation6], 4096   ;;  %p3924_p9 = pmov %p3921_p0 }
  0x57   : > { %v2968_v0 = vmov 0   ;;  %v2616_v1 = vld [vmem:[#allocation2 + $0x4] ss:$16 sps:$4 sm:$0xff]   ;;  %v2618_v2 = vld [vmem:[#allocation2 + $0xc] ss:$16 sps:$4 sm:$0xff]   ;;  %s3152_s21 = sshll.u32 %s3046_s13, 4 }
  0x58   : > { %2937 = vsyncadd (%p3924_p9), [#allocation6], 4294963200  ;;  %697 = vmatprep.mubr.bf16.mxu0 %v2968_v0  ;;  %810 = vmatprep.mubr.bf16.mxu1 %v2968_v0  ;;  %v2620_v3 = vld [vmem:[#allocation2] ss:$16 sps:$4 sm:$0xff]   ;;  %v2621_v4 = vld [vmem:[#allocation2 + $0x8] ss:$16 sps:$4 sm:$0xff]  }
  0x59   : > { %2614 = vset.pattern.permute.xlu0 %v2968_v0  ;;  %2615 = vset.pattern.permute.xlu1 %v2968_v0  ;;  %v2622_v5 = vld [vmem:[#allocation2 + $0x24] ss:$16 sps:$4 sm:$0xff]   ;;  %v2624_v6 = vld [vmem:[#allocation2 + $0x2c] ss:$16 sps:$4 sm:$0xff]   ;;  %v2626_v7 = vld [vmem:[#allocation2 + $0x20] ss:$16 sps:$4 sm:$0xff]  }
  0x5a   : > { %665 = vmatprep.subr.bf16.mxu0 %v2616_v1  ;;  %778 = vmatprep.subr.bf16.mxu1 %v2618_v2  ;;  %v2627_v8 = vld [vmem:[#allocation2 + $0x28] ss:$16 sps:$4 sm:$0xff]   ;;  %v2628_v9 = vld [vmem:[#allocation2 + $0x44] ss:$16 sps:$4 sm:$0xff]   ;;  %v2630_v10 = vld [vmem:[#allocation2 + $0x4c] ss:$16 sps:$4 sm:$0xff]  }
  0x5b   : > { %666 = vmatpush1.bf16.msra.mxu0 %v2620_v3  ;;  %779 = vmatpush1.bf16.msra.mxu1 %v2621_v4  ;;  %v2632_v11 = vld [vmem:[#allocation2 + $0x40] ss:$16 sps:$4 sm:$0xff]   ;;  %v2633_v12 = vld [vmem:[#allocation2 + $0x48] ss:$16 sps:$4 sm:$0xff]   ;;  %v2634_v13 = vld [vmem:[#allocation2 + $0x64] ss:$16 sps:$4 sm:$0xff]  }
  0x5c   : > { %667 = vmatprep.subr.bf16.mxu0 %v2622_v5  ;;  %780 = vmatprep.subr.bf16.mxu1 %v2624_v6  ;;  %v2636_v14 = vld [vmem:[#allocation2 + $0x6c] ss:$16 sps:$4 sm:$0xff]   ;;  %v2638_v15 = vld [vmem:[#allocation2 + $0x60] ss:$16 sps:$4 sm:$0xff]   ;;  %v2639_v16 = vld [vmem:[#allocation2 + $0x68] ss:$16 sps:$4 sm:$0xff]  }
  0x5d   : > { %v2640_v17 = vld [vmem:[#allocation2 + $0x84] ss:$16 sps:$4 sm:$0xff]   ;;  %p406_p12 = scmp.lt.s32.totalorder %s3152_s21, 37  ;;  %v2642_v18 = vld [vmem:[#allocation2 + $0x8c] ss:$16 sps:$4 sm:$0xff]   ;;  %s3925_s0 = sld [smem:[#allocation18_spill]] }
  0x5e   : > { %v2644_v19 = vld [vmem:[#allocation2 + $0x80] ss:$16 sps:$4 sm:$0xff]   ;;  %v2645_v20 = vld [vmem:[#allocation2 + $0x88] ss:$16 sps:$4 sm:$0xff]   ;;  %v2646_v21 = vld [vmem:[#allocation2 + $0xa4] ss:$16 sps:$4 sm:$0xff]  }
  0x5f   : > { %668 = vmatpush1.bf16.msra.mxu0 %v2626_v7  ;;  %781 = vmatpush1.bf16.msra.mxu1 %v2627_v8  ;;  %s407_s24 = scalar_select %p406_p12, %s3152_s21, 37  ;;  %v2648_v22 = vld [vmem:[#allocation2 + $0xac] ss:$16 sps:$4 sm:$0xff]   ;;  %v2650_v23 = vld [vmem:[#allocation2 + $0xa0] ss:$16 sps:$4 sm:$0xff]   ;;  %vm1901_vm15 = vcmask 7168  }
  0x60   : > { %669 = vmatprep.subr.bf16.mxu0 %v2628_v9  ;;  %782 = vmatprep.subr.bf16.mxu1 %v2630_v10  ;;  %v2651_v24 = vld [vmem:[#allocation2 + $0xa8] ss:$16 sps:$4 sm:$0xff]   ;;  %v2652_v25 = vld [vmem:[#allocation2 + $0xc4] ss:$16 sps:$4 sm:$0xff]   ;;  %v2654_v26 = vld [vmem:[#allocation2 + $0xcc] ss:$16 sps:$4 sm:$0xff]  }
  0x61   : > { %s2233_s26 = sshll.u32 %s407_s24, 3  ;;  %v2656_v27 = vld [vmem:[#allocation2 + $0xc0] ss:$16 sps:$4 sm:$0xff]   ;;  %v2657_v28 = vld [vmem:[#allocation2 + $0xc8] ss:$16 sps:$4 sm:$0xff]   ;;  %p416_p10 = scmp.lt.s32.totalorder %s3152_s21, 47 }
  0x62   : > { %v2658_v29 = vld [vmem:[#allocation2 + $0xe4] ss:$16 sps:$4 sm:$0xff]   ;;  %v2660_v30 = vld [vmem:[#allocation2 + $0xec] ss:$16 sps:$4 sm:$0xff]   ;;  %v2662_v31 = vld [vmem:[#allocation2 + $0xe0] ss:$16 sps:$4 sm:$0xff]  }
  0x63   : > { %670 = vmatpush1.bf16.msra.mxu0 %v2632_v11  ;;  %783 = vmatpush1.bf16.msra.mxu1 %v2633_v12  ;;  %s3159_s29 = scalar_lea.vmem %s3925_s0, %s2233_s26  ;;  %v2663_v32 = vld [vmem:[#allocation2 + $0xe8] ss:$16 sps:$4 sm:$0xff]   ;;  %v2664_v35 = vld [vmem:[#allocation5 + $0x40] sm:$0xff]   ;;  %v2672_v46 = vld [vmem:[#allocation5 + $0x50] sm:$0xff]   ;;  %s3301_s24 = sand.u32 1, %s2952_s10  }
  0x64   : > { %671 = vmatprep.subr.bf16.mxu0 %v2634_v13  ;;  %784 = vmatprep.subr.bf16.mxu1 %v2636_v14  ;;  %v427_v33 = vld [vmem:[%s3159_s29] sm:$0xff]  ;;  %v428_v34 = vld [vmem:[%s3159_s29 + $0x8] sm:$0xff]  ;;  %v429_v41 = vld [vmem:[%s3159_s29 + $0x10] sm:$0xff]  ;;  %s417_s16 = scalar_select %p416_p10, %s3152_s21, 47 }
  0x65   : > { %v2666_v36 = vld [vmem:[#allocation5 + $0xc0] sm:$0xff]   ;;  %v443_v37 = vpack.c.bf16 %v428_v34, %v427_v33  ;;  %v2668_v40 = vld [vmem:[#allocation5 + $0x48] sm:$0xff]   ;;  %v430_v42 = vld [vmem:[%s3159_s29 + $0x18] sm:$0xff]  ;;  %s2231_s14 = sshll.u32 %s3301_s24, 6  ;;  %s394_s22 = scalar_lea.vmem [#allocation8], %s3301_s24 }
  0x66   : > { %v2665_v38 = vld [vmem:[#allocation5] sm:$0xff]   ;;  %v2670_v43 = vld [vmem:[#allocation5 + $0xc8] sm:$0xff]   ;;  %v2674_v47 = vld [vmem:[#allocation5 + $0xd0] sm:$0xff]   ;;  %v444_v48 = vpack.c.bf16 %v430_v42, %v429_v41  ;;  %s2235_s17 = sshll.u32 %s417_s16, 3  ;;  %s3909_s16 = scalar_lea.vmem [#allocation10], %s3301_s24 }
  0x67   : > { %672 = vmatpush1.bf16.msra.mxu0 %v2638_v15  ;;  %785 = vmatpush1.bf16.msra.mxu1 %v2639_v16  ;;  %v2667_v39 = vld [vmem:[#allocation5 + $0x80] sm:$0xff]   ;;  %v2669_v44 = vld [vmem:[#allocation5 + $0x8] sm:$0xff]   ;;  %v2673_v49 = vld [vmem:[#allocation5 + $0x10] sm:$0xff]   ;;  %s3196_s23 = scalar_lea.vmem %s3894_s6, %s2235_s17  ;;  %s2025_s17 = sand.u32 1, %s3046_s13  }
  0x68   : > { %673 = vmatprep.subr.bf16.mxu0 %v2640_v17  ;;  %786 = vmatprep.subr.bf16.mxu1 %v2642_v18  ;;  %v2671_v45 = vld [vmem:[#allocation5 + $0x88] sm:$0xff]   ;;  %v2675_v50 = vld [vmem:[#allocation5 + $0x90] sm:$0xff]   ;;  %v2676_v51 = vld [vmem:[#allocation5 + $0x58] sm:$0xff]   ;;  %s2021_s25 = scalar_lea.sflag [#allocation4], %s3301_s24  ;;  %p3930_p1 = scmp.ne.s32.totalorder %s3915_s19, 0 }
  0x69   : > { %v431_v52 = vld [vmem:[%s3159_s29 + $0x20] sm:$0xff]  ;;  %v432_v53 = vld [vmem:[%s3159_s29 + $0x28] sm:$0xff]  ;;  %v2678_v54 = vld [vmem:[#allocation5 + $0xd8] sm:$0xff]   ;;  %s2037_s11 = ssub.s32 (%p3930_p1), 38, %s3152_s21 }
  0x6a   : > { %v2677_v55 = vld [vmem:[#allocation5 + $0x18] sm:$0xff]   ;;  %v2680_v57 = vld [vmem:[#allocation5 + $0x60] sm:$0xff]   ;;  %v445_v59 = vpack.c.bf16 %v432_v53, %v431_v52  ;;  %v2684_v62 = vld [vmem:[#allocation5 + $0x68] sm:$0xff]   ;;  %p2038_p2 = scmp.lt.s32.totalorder (%p3930_p1), %s2037_s11, 16 }
  0x6b   : > { %674 = vmatpush1.bf16.msra.mxu0 %v2644_v19  ;;  %787 = vmatpush1.bf16.msra.mxu1 %v2645_v20  ;;  %v2679_v56 = vld [vmem:[#allocation5 + $0x98] sm:$0xff]   ;;  %v2682_v58 = vld [vmem:[#allocation5 + $0xe0] sm:$0xff]   ;;  %v433_v63 = vld [vmem:[%s3159_s29 + $0x30] sm:$0xff] }
  0x6c   : > { %675 = vmatprep.subr.bf16.mxu0 %v2646_v21  ;;  %788 = vmatprep.subr.bf16.mxu1 %v2648_v22  ;;  %v2681_v60 = vld [vmem:[#allocation5 + $0x20] sm:$0xff]   ;;  %v2686_v1 = vld [vmem:[#allocation5 + $0xe8] sm:$0xff]   ;;  %v434_v2 = vld [vmem:[%s3159_s29 + $0x38] sm:$0xff] }
  0x6d   : > { %v2683_v61 = vld [vmem:[#allocation5 + $0xa0] sm:$0xff]   ;;  %v2685_v3 = vld [vmem:[#allocation5 + $0x28] sm:$0xff]   ;;  %v2688_v5 = vld [vmem:[#allocation5 + $0x70] sm:$0xff]   ;;  %v446_v7 = vpack.c.bf16 %v434_v2, %v433_v63 }
  0x6e   : > { %v2687_v4 = vld [vmem:[#allocation5 + $0xa8] sm:$0xff]   ;;  %v2690_v6 = vld [vmem:[#allocation5 + $0xf0] sm:$0xff]   ;;  %v435_v10 = vld [vmem:[%s3159_s29 + $0x40] sm:$0xff] }
  0x6f   : > { %676 = vmatpush1.bf16.msra.mxu0 %v2650_v23  ;;  %789 = vmatpush1.bf16.msra.mxu1 %v2651_v24  ;;  %v2689_v8 = vld [vmem:[#allocation5 + $0x30] sm:$0xff]   ;;  %v436_v11 = vld [vmem:[%s3159_s29 + $0x48] sm:$0xff]  ;;  %v438_v14 = vld [vmem:[%s3159_s29 + $0x58] sm:$0xff] }
  0x70   : > { %677 = vmatprep.subr.bf16.mxu0 %v2652_v25  ;;  %790 = vmatprep.subr.bf16.mxu1 %v2654_v26  ;;  %v2691_v9 = vld [vmem:[#allocation5 + $0xb0] sm:$0xff]   ;;  %v447_v12 = vpack.c.bf16 %v436_v11, %v435_v10  ;;  %v439_v16 = vld [vmem:[%s3159_s29 + $0x60] sm:$0xff]  ;;  %v440_v17 = vld [vmem:[%s3159_s29 + $0x68] sm:$0xff] }
  0x71   : > { %v437_v13 = vld [vmem:[%s3159_s29 + $0x50] sm:$0xff]  ;;  %v449_v18 = vpack.c.bf16 %v440_v17, %v439_v16  ;;  %v442_v20 = vld [vmem:[%s3159_s29 + $0x78] sm:$0xff]  ;;  %v1541_v26 = vld [vmem:[%s3196_s23 + $0x8] sm:$0xff] }
  0x72   : > { %v448_v15 = vpack.c.bf16 %v438_v14, %v437_v13  ;;  %v441_v19 = vld [vmem:[%s3159_s29 + $0x70] sm:$0xff]  ;;  %v2692_v22 = vld [vmem:[#allocation5 + $0x78] sm:$0xff]   ;;  %1745 = vperm.xlu1 %2615, %v1541_v26   ;;  %v1545_v33 = vld [vmem:[%s3196_s23 + $0x28] sm:$0xff]  ;;  %s3329_s29 = scalar_lea.vmem [#allocation7], %s2231_s14 }
  0x73   : > { %678 = vmatpush1.bf16.msra.mxu0 %v2656_v27  ;;  %791 = vmatpush1.bf16.msra.mxu1 %v2657_v28  ;;  %v450_v21 = vpack.c.bf16 %v442_v20, %v441_v19  ;;  %v2694_v23 = vld [vmem:[#allocation5 + $0xf8] sm:$0xff]   ;;  %v1542_v27 = vld [vmem:[%s3196_s23 + $0x10] sm:$0xff]  ;;  %v1549_v28 = vld [vmem:[%s3196_s23 + $0x48] sm:$0xff] }
  0x74   : > { %679 = vmatprep.subr.bf16.mxu0 %v2658_v29  ;;  %792 = vmatprep.subr.bf16.mxu1 %v2660_v30  ;;  %v2693_v24 = vld [vmem:[#allocation5 + $0x38] sm:$0xff]   ;;  %v1546_v34 = vld [vmem:[%s3196_s23 + $0x30] sm:$0xff] }
  0x75   : > { %v2695_v25 = vld [vmem:[#allocation5 + $0xb8] sm:$0xff]  }
  0x76   : > { %1748 = vperm.xlu1 %2615, %v1542_v27   ;;  %v1543_v29 = vld [vmem:[%s3196_s23 + $0x18] sm:$0xff] }
  0x77   : > { %680 = vmatpush1.bf16.msra.mxu0 %v2662_v31  ;;  %793 = vmatpush1.bf16.msra.mxu1 %v2663_v32  ;;  %v1551_v30 = vld [vmem:[%s3196_s23 + $0x58] sm:$0xff]  ;;  %v1544_v31 = vld [vmem:[%s3196_s23 + $0x20] sm:$0xff]  ;;  %v1553_v32 = vld [vmem:[%s3196_s23 + $0x68] sm:$0xff] }
  0x78   : > { %2409 = vmatprep.subr.bf16.mxu0 %v2664_v35  ;;  %2473 = vmatprep.subr.bf16.mxu1 %v2666_v36  ;;  %v1547_v35 = vld [vmem:[%s3196_s23 + $0x38] sm:$0xff]  ;;  %v1548_v36 = vld [vmem:[%s3196_s23 + $0x40] sm:$0xff] }
  0x7a   : > { %698 = vmatmul.mubr.bf16.vlgmr.msra.gmra.mrb[0].mxu0 %v443_v37  ;;  %811 = vmatmul.mubr.bf16.vlgmr.msra.gmra.mrb[0].mxu1 %v443_v37  ;;  %v1550_v37 = vld [vmem:[%s3196_s23 + $0x50] sm:$0xff] }
  0x7b   : > { %707 = vmatprep.mubr.bf16.mxu0 %v2968_v0  ;;  %820 = vmatprep.mubr.bf16.mxu1 %v2968_v0 }
  0x7c   : > { %2410 = vmatpush3.bf16.msra.mxu0 %v2665_v38  ;;  %2474 = vmatpush3.bf16.msra.mxu1 %v2667_v39  ;;  %v1552_v38 = vld [vmem:[%s3196_s23 + $0x60] sm:$0xff]  ;;  %v485_v39 = vlaneseq }
  0x7d   : > { %2411 = vmatprep.subr.bf16.mxu0 %v2668_v40  ;;  %2475 = vmatprep.subr.bf16.mxu1 %v2670_v43  ;;  %v483_v43 = vld [vmem:[%s3890_s2] sm:$0xf] }
  0x7e   : > { %1751 = vperm.xlu1 %2615, %v1543_v29   ;;  %v486_v40 = vshrl.u32 %v485_v39, 7 }
  0x80   : > { %2412 = vmatpush3.bf16.msra.mxu0 %v2669_v44  ;;  %2476 = vmatpush3.bf16.msra.mxu1 %v2671_v45  ;;  %v487_v41 = vsub.s32 0, %v486_v40  ;;  %v495_v42 = vsub.s32 2, %v486_v40  ;;  %v491_v44 = vsub.s32 1, %v486_v40  ;;  %v499_v45 = vsub.s32 3, %v486_v40 }
  0x81   : > { %2413 = vmatprep.subr.bf16.mxu0 %v2672_v46  ;;  %2477 = vmatprep.subr.bf16.mxu1 %v2674_v47 }
  0x82   : > { %708 = vmatmul.mubr.bf16.gmra.mrb[4].mxu0 %v444_v48  ;;  %821 = vmatmul.mubr.bf16.gmra.mrb[4].mxu1 %v444_v48  ;;  %v3216_v46 = vrot.slane %v483_v43, %v487_v41  ;;  %v3218_v47 = vrot.slane %v483_v43, %v495_v42  ;;  %v3220_v48 = vrot.slane %v483_v43, %v491_v44 }
  0x83   : > { %717 = vmatprep.mubr.bf16.mxu0 %v2968_v0  ;;  %830 = vmatprep.mubr.bf16.mxu1 %v2968_v0 }
  0x84   : > { %2414 = vmatpush3.bf16.msra.mxu0 %v2673_v49  ;;  %2478 = vmatpush3.bf16.msra.mxu1 %v2675_v50  ;;  %v3222_v49 = vrot.slane %v483_v43, %v499_v45 }
  0x85   : > { %2415 = vmatprep.subr.bf16.mxu0 %v2676_v51  ;;  %2479 = vmatprep.subr.bf16.mxu1 %v2678_v54 }
  0x86   : > { %1754 = vperm.xlu1 %2615, %v1544_v31  }
  0x88   : > { %2416 = vmatpush3.bf16.msra.mxu0 %v2677_v55  ;;  %2480 = vmatpush3.bf16.msra.mxu1 %v2679_v56 }
  0x89   : > { %2417 = vmatprep.subr.bf16.mxu0 %v2680_v57  ;;  %2481 = vmatprep.subr.bf16.mxu1 %v2682_v58 }
  0x8a   : > { %718 = vmatmul.mubr.bf16.gmra.mrb[8].mxu0 %v445_v59  ;;  %831 = vmatmul.mubr.bf16.gmra.mrb[8].mxu1 %v445_v59 }
  0x8b   : > { %727 = vmatprep.mubr.bf16.mxu0 %v2968_v0  ;;  %840 = vmatprep.mubr.bf16.mxu1 %v2968_v0 }
  0x8c   : > { %2418 = vmatpush3.bf16.msra.mxu0 %v2681_v60  ;;  %2482 = vmatpush3.bf16.msra.mxu1 %v2683_v61 }
  0x8d   : > { %2419 = vmatprep.subr.bf16.mxu0 %v2684_v62  ;;  %2483 = vmatprep.subr.bf16.mxu1 %v2686_v1 }
  0x8e   : > { %1757 = vperm.xlu1 %2615, %v1545_v33  }
  0x90   : > { %2420 = vmatpush3.bf16.msra.mxu0 %v2685_v3  ;;  %2484 = vmatpush3.bf16.msra.mxu1 %v2687_v4 }
  0x91   : > { %2421 = vmatprep.subr.bf16.mxu0 %v2688_v5  ;;  %2485 = vmatprep.subr.bf16.mxu1 %v2690_v6 }
  0x92   : > { %728 = vmatmul.mubr.bf16.gmra.mrb[12].mxu0 %v446_v7  ;;  %841 = vmatmul.mubr.bf16.gmra.mrb[12].mxu1 %v446_v7 }
  0x93   : > { %737 = vmatprep.mubr.bf16.mxu0 %v2968_v0  ;;  %850 = vmatprep.mubr.bf16.mxu1 %v2968_v0 }
  0x94   : > { %2422 = vmatpush3.bf16.msra.mxu0 %v2689_v8  ;;  %2486 = vmatpush3.bf16.msra.mxu1 %v2691_v9 }
  0x95   : > { %2423 = vmatprep.subr.bf16.mxu0 %v2692_v22  ;;  %2487 = vmatprep.subr.bf16.mxu1 %v2694_v23 }
  0x96   : > { %1760 = vperm.xlu1 %2615, %v1546_v34  }
  0x98   : > { %2424 = vmatpush3.bf16.msra.mxu0 %v2693_v24  ;;  %2488 = vmatpush3.bf16.msra.mxu1 %v2695_v25 }
  0x9a   : > { %738 = vmatmul.mubr.bf16.gmra.mrb[16].mxu0 %v447_v12  ;;  %851 = vmatmul.mubr.bf16.gmra.mrb[16].mxu1 %v447_v12 }
  0x9b   : > { %747 = vmatprep.mubr.bf16.mxu0 %v2968_v0  ;;  %860 = vmatprep.mubr.bf16.mxu1 %v2968_v0 }
  0x9c   : > { %1763 = vperm.xlu1 %2615, %v1547_v35  }
  0xa0   : > { %1766 = vperm.xlu1 %2615, %v1548_v36  }
  0xa2   : > { %748 = vmatmul.mubr.bf16.gmra.mrb[20].mxu0 %v448_v15  ;;  %861 = vmatmul.mubr.bf16.gmra.mrb[20].mxu1 %v448_v15 }
  0xa3   : > { %757 = vmatprep.mubr.bf16.mxu0 %v2968_v0  ;;  %870 = vmatprep.mubr.bf16.mxu1 %v2968_v0 }
  0xa4   : > { %1772 = vperm.xlu1 %2615, %v1550_v37  }
  0xa8   : > { %1778 = vperm.xlu1 %2615, %v1552_v38  }
  0xaa   : > { %758 = vmatmul.mubr.bf16.gmra.mrb[24].mxu0 %v449_v18  ;;  %871 = vmatmul.mubr.bf16.gmra.mrb[24].mxu1 %v449_v18 }
  0xab   : > { %767 = vmatprep.mubr.bf16.mxu0 %v2968_v0  ;;  %880 = vmatprep.mubr.bf16.mxu1 %v2968_v0  ;;  %v1540_v0 = vld [vmem:[%s3196_s23] sm:$0xff] }
  0xac   : > { %1742 = vperm.xlu0 %2614, %v1540_v0  }
  0xb0   : > { %1769 = vperm.xlu0 %2614, %v1549_v28  }
  0xb2   : > { %768 = vmatmul.mubr.bf16.gmra.mrb[28].mxu0 %v450_v21  ;;  %881 = vmatmul.mubr.bf16.gmra.mrb[28].mxu1 %v450_v21 }
  0xb4   : > { %1775 = vperm.xlu0 %2614, %v1551_v30  }
  0xb8   : > { %1781 = vperm.xlu0 %2614, %v1553_v32  }
 0x14d   : > { %v699_v50 = vpop.f32.mrb[0].mxu0  ;;  %v812_v51 = vpop.f32.mrb[0].mxu1 }
 0x14e   : > { %v700_v52 = vadd.f32 %v699_v50, %v3216_v46  ;;  %v813_v53 = vadd.f32 %v812_v51, %v3218_v47  ;;  %v701_v54 = vpop.f32.mrb[1].mxu0  ;;  %v814_v55 = vpop.f32.mrb[1].mxu1 }
 0x14f   : > { %v702_v56 = vadd.f32 %v701_v54, %v3220_v48  ;;  %v815_v57 = vadd.f32 %v814_v55, %v3222_v49  ;;  %v703_v58 = vpop.f32.mrb[2].mxu0  ;;  %v816_v59 = vpop.f32.mrb[2].mxu1 }
 0x150   : > { %v893_v60 = vmax.f32 %v813_v53, 0.0  ;;  %v704_v61 = vadd.f32 %v703_v58, %v3216_v46  ;;  %v817_v62 = vadd.f32 %v816_v59, %v3218_v47  ;;  %v705_v63 = vpop.f32.mrb[3].mxu0  ;;  %v818_v1 = vpop.f32.mrb[3].mxu1  ;;  %v891_v5 = vmax.f32 %v700_v52, 0.0 }
 0x151   : > { %v894_v2 = vmax.f32 %v815_v57, 0.0  ;;  %v706_v3 = vadd.f32 %v705_v63, %v3220_v48  ;;  %v819_v4 = vadd.f32 %v818_v1, %v3222_v49  ;;  %v892_v8 = vmax.f32 %v702_v56, 0.0 }
 0x152   : > { %v895_v6 = vmax.f32 %v704_v61, 0.0  ;;  %v897_v7 = vmax.f32 %v817_v62, 0.0 }
 0x153   : > { %v896_v9 = vmax.f32 %v706_v3, 0.0  ;;  %v898_v10 = vmax.f32 %v819_v4, 0.0 }
 0x154   : > { %v955_v11 = vpack.c.bf16 %v895_v6, %v891_v5  ;;  %v957_v12 = vpack.c.bf16 %v897_v7, %v893_v60 }
 0x155   : > { %v956_v13 = vpack.c.bf16 %v896_v9, %v892_v8  ;;  %v958_v14 = vpack.c.bf16 %v898_v10, %v894_v2  ;;  %v709_v15 = vpop.f32.mrb[4].mxu0  ;;  %v822_v16 = vpop.f32.mrb[4].mxu1 }
 0x156   : > { %v710_v17 = vadd.f32 %v709_v15, %v3216_v46  ;;  %v823_v18 = vadd.f32 %v822_v16, %v3218_v47  ;;  %v711_v19 = vpop.f32.mrb[5].mxu0  ;;  %v824_v20 = vpop.f32.mrb[5].mxu1 }
 0x157   : > { %v712_v21 = vadd.f32 %v711_v19, %v3220_v48  ;;  %v825_v22 = vadd.f32 %v824_v20, %v3222_v49  ;;  %v713_v23 = vpop.f32.mrb[6].mxu0  ;;  %v826_v24 = vpop.f32.mrb[6].mxu1  ;;  %1282 = vmatprep.mubr.bf16.mxu0 %v956_v13  ;;  %1379 = vmatprep.mubr.bf16.mxu1 %v958_v14 }
 0x158   : > { %v901_v25 = vmax.f32 %v823_v18, 0.0  ;;  %v714_v0 = vadd.f32 %v713_v23, %v3216_v46  ;;  %v827_v26 = vadd.f32 %v826_v24, %v3218_v47  ;;  %v715_v27 = vpop.f32.mrb[7].mxu0  ;;  %v828_v28 = vpop.f32.mrb[7].mxu1  ;;  %1283 = vmatmul.mubr.bf16.vlgmr.msra.gmra.mrb[32].mxu0 %v955_v11  ;;  %1380 = vmatmul.mubr.bf16.vlgmr.msra.gmra.mrb[32].mxu1 %v957_v12  ;;  %v899_v32 = vmax.f32 %v710_v17, 0.0 }
 0x159   : > { %v902_v29 = vmax.f32 %v825_v22, 0.0  ;;  %v716_v30 = vadd.f32 %v715_v27, %v3220_v48  ;;  %v829_v31 = vadd.f32 %v828_v28, %v3222_v49  ;;  %v900_v35 = vmax.f32 %v712_v21, 0.0 }
 0x15a   : > { %v903_v33 = vmax.f32 %v714_v0, 0.0  ;;  %v905_v34 = vmax.f32 %v827_v26, 0.0 }
 0x15b   : > { %v904_v36 = vmax.f32 %v716_v30, 0.0  ;;  %v906_v37 = vmax.f32 %v829_v31, 0.0 }
 0x15c   : > { %v959_v38 = vpack.c.bf16 %v903_v33, %v899_v32  ;;  %v961_v40 = vpack.c.bf16 %v905_v34, %v901_v25 }
 0x15d   : > { %v960_v41 = vpack.c.bf16 %v904_v36, %v900_v35  ;;  %v962_v42 = vpack.c.bf16 %v906_v37, %v902_v29  ;;  %v719_v43 = vpop.f32.mrb[8].mxu0  ;;  %v832_v44 = vpop.f32.mrb[8].mxu1 }
 0x15e   : > { %v720_v45 = vadd.f32 %v719_v43, %v3216_v46  ;;  %v833_v50 = vadd.f32 %v832_v44, %v3218_v47  ;;  %v721_v51 = vpop.f32.mrb[9].mxu0  ;;  %v834_v52 = vpop.f32.mrb[9].mxu1 }
 0x15f   : > { %v722_v53 = vadd.f32 %v721_v51, %v3220_v48  ;;  %v835_v54 = vadd.f32 %v834_v52, %v3222_v49  ;;  %v723_v55 = vpop.f32.mrb[10].mxu0  ;;  %v836_v56 = vpop.f32.mrb[10].mxu1  ;;  %1290 = vmatprep.mubr.bf16.mxu0 %v960_v41  ;;  %1387 = vmatprep.mubr.bf16.mxu1 %v962_v42 }
 0x160   : > { %v909_v57 = vmax.f32 %v833_v50, 0.0  ;;  %v724_v58 = vadd.f32 %v723_v55, %v3216_v46  ;;  %v837_v59 = vadd.f32 %v836_v56, %v3218_v47  ;;  %v725_v60 = vpop.f32.mrb[11].mxu0  ;;  %v838_v61 = vpop.f32.mrb[11].mxu1  ;;  %1291 = vmatmul.mubr.bf16.gmra.mrb[36].mxu0 %v959_v38  ;;  %1388 = vmatmul.mubr.bf16.gmra.mrb[36].mxu1 %v961_v40  ;;  %v907_v2 = vmax.f32 %v720_v45, 0.0 }
 0x161   : > { %v910_v62 = vmax.f32 %v835_v54, 0.0  ;;  %v726_v63 = vadd.f32 %v725_v60, %v3220_v48  ;;  %v839_v1 = vadd.f32 %v838_v61, %v3222_v49  ;;  %v908_v5 = vmax.f32 %v722_v53, 0.0 }
 0x162   : > { %v911_v3 = vmax.f32 %v724_v58, 0.0  ;;  %v913_v4 = vmax.f32 %v837_v59, 0.0 }
 0x163   : > { %v912_v6 = vmax.f32 %v726_v63, 0.0  ;;  %v914_v7 = vmax.f32 %v839_v1, 0.0 }
 0x164   : > { %v963_v8 = vpack.c.bf16 %v911_v3, %v907_v2  ;;  %v965_v9 = vpack.c.bf16 %v913_v4, %v909_v57 }
 0x165   : > { %v964_v10 = vpack.c.bf16 %v912_v6, %v908_v5  ;;  %v966_v11 = vpack.c.bf16 %v914_v7, %v910_v62  ;;  %v729_v12 = vpop.f32.mrb[12].mxu0  ;;  %v842_v13 = vpop.f32.mrb[12].mxu1 }
 0x166   : > { %v730_v14 = vadd.f32 %v729_v12, %v3216_v46  ;;  %v843_v15 = vadd.f32 %v842_v13, %v3218_v47  ;;  %v731_v16 = vpop.f32.mrb[13].mxu0  ;;  %v844_v17 = vpop.f32.mrb[13].mxu1 }
 0x167   : > { %v732_v18 = vadd.f32 %v731_v16, %v3220_v48  ;;  %v845_v19 = vadd.f32 %v844_v17, %v3222_v49  ;;  %v733_v20 = vpop.f32.mrb[14].mxu0  ;;  %v846_v21 = vpop.f32.mrb[14].mxu1  ;;  %1298 = vmatprep.mubr.bf16.mxu0 %v964_v10  ;;  %1395 = vmatprep.mubr.bf16.mxu1 %v966_v11 }
 0x168   : > { %v917_v22 = vmax.f32 %v843_v15, 0.0  ;;  %v734_v23 = vadd.f32 %v733_v20, %v3216_v46  ;;  %v847_v24 = vadd.f32 %v846_v21, %v3218_v47  ;;  %v735_v25 = vpop.f32.mrb[15].mxu0  ;;  %v848_v0 = vpop.f32.mrb[15].mxu1  ;;  %1299 = vmatmul.mubr.bf16.gmra.mrb[40].mxu0 %v963_v8  ;;  %1396 = vmatmul.mubr.bf16.gmra.mrb[40].mxu1 %v965_v9  ;;  %v915_v29 = vmax.f32 %v730_v14, 0.0 }
 0x169   : > { %v918_v26 = vmax.f32 %v845_v19, 0.0  ;;  %v736_v27 = vadd.f32 %v735_v25, %v3220_v48  ;;  %v849_v28 = vadd.f32 %v848_v0, %v3222_v49  ;;  %v916_v32 = vmax.f32 %v732_v18, 0.0 }
 0x16a   : > { %v919_v30 = vmax.f32 %v734_v23, 0.0  ;;  %v921_v31 = vmax.f32 %v847_v24, 0.0 }
 0x16b   : > { %v920_v33 = vmax.f32 %v736_v27, 0.0  ;;  %v922_v34 = vmax.f32 %v849_v28, 0.0 }
 0x16c   : > { %v967_v35 = vpack.c.bf16 %v919_v30, %v915_v29  ;;  %v969_v36 = vpack.c.bf16 %v921_v31, %v917_v22 }
 0x16d   : > { %v968_v37 = vpack.c.bf16 %v920_v33, %v916_v32  ;;  %v970_v38 = vpack.c.bf16 %v922_v34, %v918_v26  ;;  %v739_v40 = vpop.f32.mrb[16].mxu0  ;;  %v852_v41 = vpop.f32.mrb[16].mxu1 }
 0x16e   : > { %v740_v42 = vadd.f32 %v739_v40, %v3216_v46  ;;  %v853_v43 = vadd.f32 %v852_v41, %v3218_v47  ;;  %v741_v44 = vpop.f32.mrb[17].mxu0  ;;  %v854_v45 = vpop.f32.mrb[17].mxu1 }
 0x16f   : > { %v742_v50 = vadd.f32 %v741_v44, %v3220_v48  ;;  %v855_v51 = vadd.f32 %v854_v45, %v3222_v49  ;;  %v743_v52 = vpop.f32.mrb[18].mxu0  ;;  %v856_v53 = vpop.f32.mrb[18].mxu1  ;;  %1306 = vmatprep.mubr.bf16.mxu0 %v968_v37  ;;  %1403 = vmatprep.mubr.bf16.mxu1 %v970_v38 }
 0x170   : > { %v925_v54 = vmax.f32 %v853_v43, 0.0  ;;  %v744_v55 = vadd.f32 %v743_v52, %v3216_v46  ;;  %v857_v56 = vadd.f32 %v856_v53, %v3218_v47  ;;  %v745_v57 = vpop.f32.mrb[19].mxu0  ;;  %v858_v58 = vpop.f32.mrb[19].mxu1  ;;  %1307 = vmatmul.mubr.bf16.gmra.mrb[44].mxu0 %v967_v35  ;;  %1404 = vmatmul.mubr.bf16.gmra.mrb[44].mxu1 %v969_v36  ;;  %v923_v62 = vmax.f32 %v740_v42, 0.0 }
 0x171   : > { %v926_v59 = vmax.f32 %v855_v51, 0.0  ;;  %v746_v60 = vadd.f32 %v745_v57, %v3220_v48  ;;  %v859_v61 = vadd.f32 %v858_v58, %v3222_v49  ;;  %v924_v2 = vmax.f32 %v742_v50, 0.0 }
 0x172   : > { %v927_v63 = vmax.f32 %v744_v55, 0.0  ;;  %v929_v1 = vmax.f32 %v857_v56, 0.0 }
 0x173   : > { %v928_v3 = vmax.f32 %v746_v60, 0.0  ;;  %v930_v4 = vmax.f32 %v859_v61, 0.0 }
 0x174   : > { %v971_v5 = vpack.c.bf16 %v927_v63, %v923_v62  ;;  %v973_v6 = vpack.c.bf16 %v929_v1, %v925_v54 }
 0x175   : > { %v972_v7 = vpack.c.bf16 %v928_v3, %v924_v2  ;;  %v974_v8 = vpack.c.bf16 %v930_v4, %v926_v59  ;;  %v749_v9 = vpop.f32.mrb[20].mxu0  ;;  %v862_v10 = vpop.f32.mrb[20].mxu1 }
 0x176   : > { %v750_v11 = vadd.f32 %v749_v9, %v3216_v46  ;;  %v863_v12 = vadd.f32 %v862_v10, %v3218_v47  ;;  %v751_v13 = vpop.f32.mrb[21].mxu0  ;;  %v864_v14 = vpop.f32.mrb[21].mxu1 }
 0x177   : > { %v752_v15 = vadd.f32 %v751_v13, %v3220_v48  ;;  %v865_v16 = vadd.f32 %v864_v14, %v3222_v49  ;;  %v753_v17 = vpop.f32.mrb[22].mxu0  ;;  %v866_v18 = vpop.f32.mrb[22].mxu1  ;;  %1314 = vmatprep.mubr.bf16.mxu0 %v972_v7  ;;  %1411 = vmatprep.mubr.bf16.mxu1 %v974_v8 }
 0x178   : > { %v933_v19 = vmax.f32 %v863_v12, 0.0  ;;  %v754_v20 = vadd.f32 %v753_v17, %v3216_v46  ;;  %v867_v21 = vadd.f32 %v866_v18, %v3218_v47  ;;  %v755_v22 = vpop.f32.mrb[23].mxu0  ;;  %v868_v23 = vpop.f32.mrb[23].mxu1  ;;  %1315 = vmatmul.mubr.bf16.gmra.mrb[48].mxu0 %v971_v5  ;;  %1412 = vmatmul.mubr.bf16.gmra.mrb[48].mxu1 %v973_v6  ;;  %v931_v26 = vmax.f32 %v750_v11, 0.0 }
 0x179   : > { %v934_v24 = vmax.f32 %v865_v16, 0.0  ;;  %v756_v25 = vadd.f32 %v755_v22, %v3220_v48  ;;  %v869_v0 = vadd.f32 %v868_v23, %v3222_v49  ;;  %v932_v29 = vmax.f32 %v752_v15, 0.0 }
 0x17a   : > { %v935_v27 = vmax.f32 %v754_v20, 0.0  ;;  %v937_v28 = vmax.f32 %v867_v21, 0.0 }
 0x17b   : > { %v936_v30 = vmax.f32 %v756_v25, 0.0  ;;  %v938_v31 = vmax.f32 %v869_v0, 0.0 }
 0x17c   : > { %v975_v32 = vpack.c.bf16 %v935_v27, %v931_v26  ;;  %v977_v33 = vpack.c.bf16 %v937_v28, %v933_v19 }
 0x17d   : > { %v976_v34 = vpack.c.bf16 %v936_v30, %v932_v29  ;;  %v978_v35 = vpack.c.bf16 %v938_v31, %v934_v24  ;;  %v759_v36 = vpop.f32.mrb[24].mxu0  ;;  %v872_v37 = vpop.f32.mrb[24].mxu1 }
 0x17e   : > { %v760_v38 = vadd.f32 %v759_v36, %v3216_v46  ;;  %v873_v40 = vadd.f32 %v872_v37, %v3218_v47  ;;  %v761_v41 = vpop.f32.mrb[25].mxu0  ;;  %v874_v42 = vpop.f32.mrb[25].mxu1 }
 0x17f   : > { %v762_v43 = vadd.f32 %v761_v41, %v3220_v48  ;;  %v875_v44 = vadd.f32 %v874_v42, %v3222_v49  ;;  %v763_v45 = vpop.f32.mrb[26].mxu0  ;;  %v876_v50 = vpop.f32.mrb[26].mxu1  ;;  %1322 = vmatprep.mubr.bf16.mxu0 %v976_v34  ;;  %1419 = vmatprep.mubr.bf16.mxu1 %v978_v35  ;;  %v3297_v34 = vld [vmem:[%s3892_s4] ss:$0 sm:$0xff] }
 0x180   : > { %v941_v51 = vmax.f32 %v873_v40, 0.0  ;;  %v764_v52 = vadd.f32 %v763_v45, %v3216_v46  ;;  %v877_v53 = vadd.f32 %v876_v50, %v3218_v47  ;;  %v765_v54 = vpop.f32.mrb[27].mxu0  ;;  %v878_v55 = vpop.f32.mrb[27].mxu1  ;;  %1323 = vmatmul.mubr.bf16.gmra.mrb[52].mxu0 %v975_v32  ;;  %1420 = vmatmul.mubr.bf16.gmra.mrb[52].mxu1 %v977_v33  ;;  %v939_v59 = vmax.f32 %v760_v38, 0.0 }
 0x181   : > { %v942_v56 = vmax.f32 %v875_v44, 0.0  ;;  %v766_v57 = vadd.f32 %v765_v54, %v3220_v48  ;;  %v879_v58 = vadd.f32 %v878_v55, %v3222_v49  ;;  %v940_v62 = vmax.f32 %v762_v43, 0.0 }
 0x182   : > { %v943_v60 = vmax.f32 %v764_v52, 0.0  ;;  %v945_v61 = vmax.f32 %v877_v53, 0.0  ;;  %v3307_v53 = vld [vmem:[%s3893_s5] ss:$0 sm:$0xff] }
 0x183   : > { %v944_v63 = vmax.f32 %v766_v57, 0.0  ;;  %v946_v1 = vmax.f32 %v879_v58, 0.0 }
 0x184   : > { %v979_v2 = vpack.c.bf16 %v943_v60, %v939_v59  ;;  %v981_v3 = vpack.c.bf16 %v945_v61, %v941_v51 }
 0x185   : > { %v980_v4 = vpack.c.bf16 %v944_v63, %v940_v62  ;;  %v982_v5 = vpack.c.bf16 %v946_v1, %v942_v56  ;;  %v769_v6 = vpop.f32.mrb[28].mxu0  ;;  %v882_v7 = vpop.f32.mrb[28].mxu1 }
 0x186   : > { %v770_v8 = vadd.f32 %v769_v6, %v3216_v46  ;;  %v883_v9 = vadd.f32 %v882_v7, %v3218_v47  ;;  %v771_v10 = vpop.f32.mrb[29].mxu0  ;;  %v884_v11 = vpop.f32.mrb[29].mxu1 }
 0x187   : > { %v772_v12 = vadd.f32 %v771_v10, %v3220_v48  ;;  %v885_v13 = vadd.f32 %v884_v11, %v3222_v49  ;;  %v773_v14 = vpop.f32.mrb[30].mxu0  ;;  %v886_v15 = vpop.f32.mrb[30].mxu1  ;;  %1330 = vmatprep.mubr.bf16.mxu0 %v980_v4  ;;  %1427 = vmatprep.mubr.bf16.mxu1 %v982_v5 }
 0x188   : > { %v949_v16 = vmax.f32 %v883_v9, 0.0  ;;  %v774_v17 = vadd.f32 %v773_v14, %v3216_v46  ;;  %v887_v18 = vadd.f32 %v886_v15, %v3218_v47  ;;  %v775_v19 = vpop.f32.mrb[31].mxu0  ;;  %v888_v20 = vpop.f32.mrb[31].mxu1  ;;  %1331 = vmatmul.mubr.bf16.gmra.mrb[56].mxu0 %v979_v2  ;;  %1428 = vmatmul.mubr.bf16.gmra.mrb[56].mxu1 %v981_v3  ;;  %v947_v24 = vmax.f32 %v770_v8, 0.0 }
 0x189   : > { %v950_v21 = vmax.f32 %v885_v13, 0.0  ;;  %v776_v22 = vadd.f32 %v775_v19, %v3220_v48  ;;  %v889_v23 = vadd.f32 %v888_v20, %v3222_v49  ;;  %v948_v26 = vmax.f32 %v772_v12, 0.0  ;;  %v3288_v47 = vpop.permute.xlu1 %1745 }
 0x18a   : > { %v951_v25 = vmax.f32 %v774_v17, 0.0  ;;  %v953_v0 = vmax.f32 %v887_v18, 0.0 }
 0x18b   : > { %v952_v27 = vmax.f32 %v776_v22, 0.0  ;;  %v954_v28 = vmax.f32 %v889_v23, 0.0 }
 0x18c   : > { %v983_v29 = vpack.c.bf16 %v951_v25, %v947_v24  ;;  %v985_v30 = vpack.c.bf16 %v953_v0, %v949_v16 }
 0x18d   : > { %v984_v46 = vpack.c.bf16 %v952_v27, %v948_v26  ;;  %v986_v31 = vpack.c.bf16 %v954_v28, %v950_v21  ;;  %v3290_v32 = vpop.permute.xlu1 %1748 }
 0x18f   : > { %1338 = vmatprep.mubr.bf16.mxu0 %v984_v46  ;;  %1435 = vmatprep.mubr.bf16.mxu1 %v986_v31 }
 0x190   : > { %1339 = vmatmul.mubr.bf16.gmra.mrb[60].mxu0 %v983_v29  ;;  %1436 = vmatmul.mubr.bf16.gmra.mrb[60].mxu1 %v985_v30 }
 0x191   : > { %v3292_v48 = vpop.permute.xlu1 %1751 }
 0x195   : > { %v3309_v54 = vpop.permute.xlu1 %1754 }
 0x199   : > { %v1758_v13 = vpop.permute.xlu1 %1757 }
 0x22b   : > { %v2425_v49 = vpop.f32.mrb[32].mxu0  ;;  %v2489_v33 = vpop.f32.mrb[32].mxu1 }
 0x22c   : > { %v2426_v35 = vpop.f32.mrb[33].mxu0  ;;  %v2490_v36 = vpop.f32.mrb[33].mxu1 }
 0x22d   : > { %v2427_v37 = vadd.f32 %v2426_v35, %v2425_v49  ;;  %v2491_v38 = vadd.f32 %v2490_v36, %v2489_v33  ;;  %v2428_v40 = vpop.f32.mrb[34].mxu0  ;;  %v2492_v41 = vpop.f32.mrb[34].mxu1  ;;  %v3352_v33 = vand.u32 127, %v485_v39 }
 0x22e   : > { %v2429_v42 = vpop.f32.mrb[35].mxu0  ;;  %v2493_v43 = vpop.f32.mrb[35].mxu1 }
 0x22f   : > { %v1285_v44 = vadd.f32 %v2427_v37, %v3297_v34  ;;  %v2430_v45 = vadd.f32 %v2429_v42, %v2428_v40  ;;  %v2494_v50 = vadd.f32 %v2493_v43, %v2492_v41  ;;  %v1761_v35 = vpop.permute.xlu1 %1760  ;;  %vm1794_vm0 = vcmp.eq.s32.totalorder %v3352_v33, %v1758_v13 }
 0x230   : > { %vm1795_vm1 = vcmp.eq.s32.totalorder %v3352_v33, %v1761_v35  ;;  %vm1790_vm8 = vcmp.eq.s32.totalorder %v3352_v33, %v3288_v47  ;;  %vm1791_vm10 = vcmp.eq.s32.totalorder %v3352_v33, %v3290_v32  ;;  %vm1792_vm11 = vcmp.eq.s32.totalorder %v3352_v33, %v3292_v48 }
 0x231   : > { %v1382_v51 = vadd.f32 %v2491_v38, %v1285_v44  ;;  %v1288_v52 = vadd.f32 %v2430_v45, %v3297_v34  ;;  %vm1793_vm12 = vcmp.eq.s32.totalorder %v3352_v33, %v3309_v54 }
 0x233   : > { %v3311_v55 = vmax.f32 %v1382_v51, 0.0  ;;  %v1385_v56 = vadd.f32 %v2494_v50, %v1288_v52  ;;  %v2431_v57 = vpop.f32.mrb[36].mxu0  ;;  %v2495_v58 = vpop.f32.mrb[36].mxu1 }
 0x234   : > { %v2432_v59 = vpop.f32.mrb[37].mxu0  ;;  %v2496_v60 = vpop.f32.mrb[37].mxu1 }
 0x235   : > { %v3314_v61 = vmax.f32 %v1385_v56, 0.0  ;;  %v2433_v62 = vadd.f32 %v2432_v59, %v2431_v57  ;;  %v2497_v63 = vadd.f32 %v2496_v60, %v2495_v58  ;;  %v2434_v1 = vpop.f32.mrb[38].mxu0  ;;  %v2498_v2 = vpop.f32.mrb[38].mxu1  ;;  %v3318_v3 = vadd.f32 %v3307_v53, %v3311_v55 }
 0x236   : > { %v2435_v4 = vpop.f32.mrb[39].mxu0  ;;  %v2499_v5 = vpop.f32.mrb[39].mxu1 }
 0x237   : > { %v2365_v6 = vpack.c.bf16 %v3314_v61, %v3311_v55  ;;  %v1293_v7 = vadd.f32 %v2433_v62, %v3297_v34  ;;  %v2436_v8 = vadd.f32 %v2435_v4, %v2434_v1  ;;  %v2500_v9 = vadd.f32 %v2499_v5, %v2498_v2  ;;  %1579 = vmax.xlane.f32.xlu0 %v3318_v3  ;;  %v1764_v4 = vpop.permute.xlu1 %1763  ;;  %v3372_v5 = vpop.permute.xlu0 %1742 }
 0x238   : > { %v3327_v12 = vadd.f32 %v3307_v53, %v3314_v61  ;;  %vm1796_vm2 = vcmp.eq.s32.totalorder %v3352_v33, %v1764_v4  ;;  %vm1789_vm9 = vcmp.eq.s32.totalorder %v3352_v33, %v3372_v5 }
 0x239   : > { %v1390_v10 = vadd.f32 %v2497_v63, %v1293_v7  ;;  %v1296_v11 = vadd.f32 %v2436_v8, %v3297_v34  ;;  %2366 = vst [vmem:[%s3329_s29] sm:$0xff] %v2365_v6  }
 0x23b   : > { %v3332_v14 = vmax.f32 %v1390_v10, 0.0  ;;  %v1393_v15 = vadd.f32 %v2500_v9, %v1296_v11  ;;  %v2437_v16 = vpop.f32.mrb[40].mxu0  ;;  %v2501_v17 = vpop.f32.mrb[40].mxu1  ;;  %1581 = vmax.xlane.f32.xlu0 %v3327_v12 }
 0x23c   : > { %v2438_v18 = vpop.f32.mrb[41].mxu0  ;;  %v2502_v19 = vpop.f32.mrb[41].mxu1 }
 0x23d   : > { %v3335_v20 = vmax.f32 %v1393_v15, 0.0  ;;  %v2439_v21 = vadd.f32 %v2438_v18, %v2437_v16  ;;  %v2503_v22 = vadd.f32 %v2502_v19, %v2501_v17  ;;  %v2440_v23 = vpop.f32.mrb[42].mxu0  ;;  %v2504_v24 = vpop.f32.mrb[42].mxu1  ;;  %v3339_v25 = vadd.f32 %v3307_v53, %v3332_v14 }
 0x23e   : > { %v2441_v0 = vpop.f32.mrb[43].mxu0  ;;  %v2505_v26 = vpop.f32.mrb[43].mxu1 }
 0x23f   : > { %v2370_v27 = vpack.c.bf16 %v3335_v20, %v3332_v14  ;;  %v1301_v28 = vadd.f32 %v2439_v21, %v3297_v34  ;;  %v2442_v29 = vadd.f32 %v2441_v0, %v2440_v23  ;;  %v2506_v30 = vadd.f32 %v2505_v26, %v2504_v24  ;;  %1583 = vmax.xlane.f32.xlu1 %v3339_v25  ;;  %v1770_v35 = vpop.permute.xlu0 %1769 }
 0x240   : > { %v3348_v49 = vadd.f32 %v3307_v53, %v3335_v20  ;;  %vm1798_vm4 = vcmp.eq.s32.totalorder %v3352_v33, %v1770_v35  ;;  %v1808_v47 = vsel %vm1792_vm11, %v3335_v20, 0.0 }
 0x241   : > { %v1398_v46 = vadd.f32 %v2503_v22, %v1301_v28  ;;  %v1304_v31 = vadd.f32 %v2442_v29, %v3297_v34  ;;  %2402 = vst [vmem:[%s3329_s29 + $0x8] sm:$0xff] %v2370_v27   ;;  %v1767_v29 = vpop.permute.xlu1 %1766 }
 0x242   : > { %vm1797_vm3 = vcmp.eq.s32.totalorder %v3352_v33, %v1767_v29 }
 0x243   : > { %v3354_v36 = vmax.f32 %v1398_v46, 0.0  ;;  %v1401_v37 = vadd.f32 %v2506_v30, %v1304_v31  ;;  %v2443_v38 = vpop.f32.mrb[44].mxu0  ;;  %v2507_v40 = vpop.f32.mrb[44].mxu1  ;;  %1585 = vmax.xlane.f32.xlu1 %v3348_v49 }
 0x244   : > { %v2444_v41 = vpop.f32.mrb[45].mxu0  ;;  %v2508_v42 = vpop.f32.mrb[45].mxu1 }
 0x245   : > { %v1449_v43 = vmax.f32 %v1401_v37, 0.0  ;;  %v2445_v44 = vadd.f32 %v2444_v41, %v2443_v38  ;;  %v2509_v45 = vadd.f32 %v2508_v42, %v2507_v40  ;;  %v2446_v50 = vpop.f32.mrb[46].mxu0  ;;  %v2510_v51 = vpop.f32.mrb[46].mxu1  ;;  %v3360_v39 = vadd.f32 %v3307_v53, %v3354_v36 }
 0x246   : > { %v2447_v52 = vpop.f32.mrb[47].mxu0  ;;  %v2511_v56 = vpop.f32.mrb[47].mxu1 }
 0x247   : > { %v2375_v57 = vpack.c.bf16 %v1449_v43, %v3354_v36  ;;  %v1309_v58 = vadd.f32 %v2445_v44, %v3297_v34  ;;  %v2448_v59 = vadd.f32 %v2447_v52, %v2446_v50  ;;  %v2512_v60 = vadd.f32 %v2511_v56, %v2510_v51  ;;  %1587 = vmax.xlane.f32.xlu0 %v3360_v39 }
 0x248   : > { %v3366_v62 = vadd.f32 %v3307_v53, %v1449_v43  ;;  %v3368_v63 = vsel %vm1794_vm0, %v1449_v43, 0.0 }
 0x249   : > { %v1406_v1 = vadd.f32 %v2509_v45, %v1309_v58  ;;  %v1312_v2 = vadd.f32 %v2448_v59, %v3297_v34  ;;  %2403 = vst [vmem:[%s3329_s29 + $0x10] sm:$0xff] %v2375_v57  }
 0x24a   : > { %1589 = vmax.xlane.f32.xlu1 %v3366_v62 }
 0x24b   : > { %v1450_v6 = vmax.f32 %v1406_v1, 0.0  ;;  %v1409_v7 = vadd.f32 %v2512_v60, %v1312_v2  ;;  %v2449_v8 = vpop.f32.mrb[48].mxu0  ;;  %v2513_v9 = vpop.f32.mrb[48].mxu1 }
 0x24c   : > { %v2450_v10 = vpop.f32.mrb[49].mxu0  ;;  %v2514_v11 = vpop.f32.mrb[49].mxu1 }
 0x24d   : > { %v1451_v13 = vmax.f32 %v1409_v7, 0.0  ;;  %v2451_v15 = vadd.f32 %v2450_v10, %v2449_v8  ;;  %v2515_v16 = vadd.f32 %v2514_v11, %v2513_v9  ;;  %v2452_v17 = vpop.f32.mrb[50].mxu0  ;;  %v2516_v18 = vpop.f32.mrb[50].mxu1  ;;  %v3378_v19 = vadd.f32 %v3307_v53, %v1450_v6 }
 0x24e   : > { %v2453_v21 = vpop.f32.mrb[51].mxu0  ;;  %v2517_v22 = vpop.f32.mrb[51].mxu1  ;;  %v3380_v23 = vsel %vm1795_vm1, %v1450_v6, 0.0 }
 0x24f   : > { %v2380_v24 = vpack.c.bf16 %v1451_v13, %v1450_v6  ;;  %v1317_v0 = vadd.f32 %v2451_v15, %v3297_v34  ;;  %v2454_v26 = vadd.f32 %v2453_v21, %v2452_v17  ;;  %v2518_v27 = vadd.f32 %v2517_v22, %v2516_v18  ;;  %1591 = vmax.xlane.f32.xlu0 %v3378_v19  ;;  %v1773_v7 = vpop.permute.xlu1 %1772  ;;  %v1776_v11 = vpop.permute.xlu0 %1775 }
 0x250   : > { %v3385_v28 = vadd.f32 %v3307_v53, %v1451_v13  ;;  %v3389_v30 = vsel %vm1796_vm2, %v1451_v13, 0.0  ;;  %vm1799_vm5 = vcmp.eq.s32.totalorder %v3352_v33, %v1773_v7  ;;  %vm1800_vm6 = vcmp.eq.s32.totalorder %v3352_v33, %v1776_v11 }
 0x251   : > { %v1414_v46 = vadd.f32 %v2515_v16, %v1317_v0  ;;  %v1320_v31 = vadd.f32 %v2454_v26, %v3297_v34  ;;  %2404 = vst [vmem:[%s3329_s29 + $0x18] sm:$0xff] %v2380_v24  }
 0x252   : > { %1593 = vmax.xlane.f32.xlu1 %v3385_v28 }
 0x253   : > { %v1452_v37 = vmax.f32 %v1414_v46, 0.0  ;;  %v1417_v38 = vadd.f32 %v2518_v27, %v1320_v31  ;;  %v2455_v40 = vpop.f32.mrb[52].mxu0  ;;  %v2519_v41 = vpop.f32.mrb[52].mxu1 }
 0x254   : > { %v2456_v42 = vpop.f32.mrb[53].mxu0  ;;  %v2520_v43 = vpop.f32.mrb[53].mxu1 }
 0x255   : > { %v1453_v44 = vmax.f32 %v1417_v38, 0.0  ;;  %v2457_v45 = vadd.f32 %v2456_v42, %v2455_v40  ;;  %v2521_v50 = vadd.f32 %v2520_v43, %v2519_v41  ;;  %v2458_v51 = vpop.f32.mrb[54].mxu0  ;;  %v2522_v52 = vpop.f32.mrb[54].mxu1  ;;  %v3397_v56 = vadd.f32 %v3307_v53, %v1452_v37 }
 0x256   : > { %v2459_v57 = vpop.f32.mrb[55].mxu0  ;;  %v2523_v58 = vpop.f32.mrb[55].mxu1  ;;  %v3399_v59 = vsel %vm1797_vm3, %v1452_v37, 0.0 }
 0x257   : > { %v2385_v60 = vpack.c.bf16 %v1453_v44, %v1452_v37  ;;  %v1325_v1 = vadd.f32 %v2457_v45, %v3297_v34  ;;  %v2460_v2 = vadd.f32 %v2459_v57, %v2458_v51  ;;  %v2524_v4 = vadd.f32 %v2523_v58, %v2522_v52  ;;  %1595 = vmax.xlane.f32.xlu0 %v3397_v56  ;;  %v1779_v43 = vpop.permute.xlu1 %1778  ;;  %v3490_v32 = vpop.permute.xlu0 %1781 }
 0x258   : > { %v3404_v6 = vadd.f32 %v3307_v53, %v1453_v44  ;;  %v3408_v8 = vsel %vm1798_vm4, %v1453_v44, 0.0  ;;  %vm1801_vm7 = vcmp.eq.s32.totalorder %v3352_v33, %v1779_v43  ;;  %v1805_v43 = vsel %vm1789_vm9, %v3311_v55, 0.0 }
 0x259   : > { %v1422_v9 = vadd.f32 %v2521_v50, %v1325_v1  ;;  %v1328_v10 = vadd.f32 %v2460_v2, %v3297_v34  ;;  %2405 = vst [vmem:[%s3329_s29 + $0x20] sm:$0xff] %v2385_v60  }
 0x25a   : > { %1597 = vmax.xlane.f32.xlu1 %v3404_v6 }
 0x25b   : > { %v1454_v13 = vmax.f32 %v1422_v9, 0.0  ;;  %v1425_v15 = vadd.f32 %v2524_v4, %v1328_v10  ;;  %v2461_v16 = vpop.f32.mrb[56].mxu0  ;;  %v2525_v17 = vpop.f32.mrb[56].mxu1 }
 0x25c   : > { %v2462_v18 = vpop.f32.mrb[57].mxu0  ;;  %v2526_v21 = vpop.f32.mrb[57].mxu1 }
 0x25d   : > { %v1455_v22 = vmax.f32 %v1425_v15, 0.0  ;;  %v2463_v24 = vadd.f32 %v2462_v18, %v2461_v16  ;;  %v2527_v0 = vadd.f32 %v2526_v21, %v2525_v17  ;;  %v2464_v26 = vpop.f32.mrb[58].mxu0  ;;  %v2528_v27 = vpop.f32.mrb[58].mxu1  ;;  %v3416_v29 = vadd.f32 %v3307_v53, %v1454_v13 }
 0x25e   : > { %v2465_v46 = vpop.f32.mrb[59].mxu0  ;;  %v2529_v31 = vpop.f32.mrb[59].mxu1  ;;  %v3418_v35 = vsel %vm1799_vm5, %v1454_v13, 0.0 }
 0x25f   : > { %v2390_v37 = vpack.c.bf16 %v1455_v22, %v1454_v13  ;;  %v1333_v38 = vadd.f32 %v2463_v24, %v3297_v34  ;;  %v2466_v40 = vadd.f32 %v2465_v46, %v2464_v26  ;;  %v2530_v41 = vadd.f32 %v2529_v31, %v2528_v27  ;;  %1599 = vmax.xlane.f32.xlu0 %v3416_v29 }
 0x260   : > { %v3423_v42 = vadd.f32 %v3307_v53, %v1455_v22  ;;  %v3427_v44 = vsel %vm1800_vm6, %v1455_v22, 0.0 }
 0x261   : > { %v1430_v45 = vadd.f32 %v2527_v0, %v1333_v38  ;;  %v1336_v50 = vadd.f32 %v2466_v40, %v3297_v34  ;;  %2406 = vst [vmem:[%s3329_s29 + $0x28] sm:$0xff] %v2390_v37   ;;  %v3468_v40 = vld [vmem:[%s3196_s23 + $0x70] sm:$0xff] }
 0x262   : > { %1601 = vmax.xlane.f32.xlu1 %v3423_v42 }
 0x263   : > { %v1456_v51 = vmax.f32 %v1430_v45, 0.0  ;;  %v1433_v52 = vadd.f32 %v2530_v41, %v1336_v50  ;;  %v2467_v57 = vpop.f32.mrb[60].mxu0  ;;  %v2531_v58 = vpop.f32.mrb[60].mxu1  ;;  %v3472_v41 = vld [vmem:[%s3196_s23 + $0x78] sm:$0xff]  ;;  %v1807_v45 = vsel %vm1791_vm10, %v3332_v14, 0.0 }
 0x264   : > { %v2468_v60 = vpop.f32.mrb[61].mxu0  ;;  %v2532_v1 = vpop.f32.mrb[61].mxu1 }
 0x265   : > { %v3433_v2 = vmax.f32 %v1433_v52, 0.0  ;;  %v2469_v4 = vadd.f32 %v2468_v60, %v2467_v57  ;;  %v2533_v7 = vadd.f32 %v2532_v1, %v2531_v58  ;;  %v2470_v9 = vpop.f32.mrb[62].mxu0  ;;  %v2534_v10 = vpop.f32.mrb[62].mxu1  ;;  %v3436_v11 = vadd.f32 %v3307_v53, %v1456_v51  ;;  %v3509_v60 = vld [vmem:[%s3196_s23] sm:$0xff] }
 0x266   : > { %v2471_v13 = vpop.f32.mrb[63].mxu0  ;;  %v2535_v15 = vpop.f32.mrb[63].mxu1  ;;  %v3438_v16 = vsel %vm1801_vm7, %v1456_v51, 0.0  ;;  %vm1853_vm13 = vcmp.ne.s32.totalorder %v3509_v60, 4294967295 }
 0x267   : > { %v2395_v17 = vpack.c.bf16 %v3433_v2, %v1456_v51  ;;  %v1341_v18 = vadd.f32 %v2469_v4, %v3297_v34  ;;  %v2472_v21 = vadd.f32 %v2471_v13, %v2470_v9  ;;  %v2536_v22 = vadd.f32 %v2535_v15, %v2534_v10  ;;  %1603 = vmax.xlane.f32.xlu0 %v3436_v11  ;;  %v3529_v15 = vld [vmem:[%s3196_s23 + $0x10] sm:$0xff] }
 0x268   : > { %v3445_v24 = vadd.f32 %v3307_v53, %v3433_v2  ;;  %vm1855_vm0 = vcmp.ne.s32.totalorder %v3529_v15, 4294967295 }
 0x269   : > { %v1438_v0 = vadd.f32 %v2533_v7, %v1341_v18  ;;  %v1344_v26 = vadd.f32 %v2472_v21, %v3297_v34  ;;  %2407 = vst [vmem:[%s3329_s29 + $0x30] sm:$0xff] %v2395_v17  }
 0x26a   : > { %1605 = vmax.xlane.f32.xlu1 %v3445_v24 }
 0x26b   : > { %v3450_v27 = vmax.f32 %v1438_v0, 0.0  ;;  %v1441_v46 = vadd.f32 %v2536_v22, %v1344_v26  ;;  %v3540_v26 = vld [vmem:[%s3196_s23 + $0x18] sm:$0xff] }
 0x26c   : > { %vm1856_vm1 = vcmp.ne.s32.totalorder %v3540_v26, 4294967295 }
 0x26d   : > { %v3452_v31 = vmax.f32 %v1441_v46, 0.0  ;;  %v3456_v37 = vadd.f32 %v3307_v53, %v3450_v27 }
 0x26f   : > { %v2400_v38 = vpack.c.bf16 %v3452_v31, %v3450_v27  ;;  %1607 = vmax.xlane.f32.xlu0 %v3456_v37  ;;  %v3463_v34 = vadd.f32 %v3307_v53, %v3452_v31  ;;  %v1806_v53 = vsel %vm1790_vm8, %v3314_v61, 0.0  ;;  %v1809_v61 = vsel %vm1793_vm12, %v3354_v36, 0.0 }
 0x270   : > { %vm1867_vm12 = vcmp.ne.s32.totalorder %v3468_v40, 4294967295 }
 0x271   : > { %1609 = vmax.xlane.f32.xlu1 %v3463_v34  ;;  %2408 = vst [vmem:[%s3329_s29 + $0x38] sm:$0xff] %v2400_v38  }
 0x282   : > { %1784 = vperm.xlu1 %2615, %v3468_v40  }
 0x285   : > { %1787 = vperm.xlu0 %2614, %v3472_v41  }
 0x2a4   : > { %1823 = vadd.xlane.f32.xlu0 %v1806_v53 }
 0x2a6   : > { %1821 = vadd.xlane.f32.xlu1 %v1805_v43 }
 0x2a8   : > { %1825 = vadd.xlane.f32.xlu0 %v1807_v45 }
 0x2ac   : > { %1827 = vadd.xlane.f32.xlu0 %v1808_v47 }
 0x2b0   : > { %1829 = vadd.xlane.f32.xlu0 %v1809_v61 }
 0x2c4   : > { %v3492_v5 = vpop.xlane.xlu0 %1579 }
 0x2c5   : > { %v1611_v55 = vsub.f32 %v3318_v3, %v3492_v5 }
 0x2c7   : > { %v1627_v14 = vmul.f32 1.442695, %v1611_v55  ;;  %v3554_v55 = vld [vmem:[%s3196_s23 + $0x20] sm:$0xff] }
 0x2c8   : > { %v3496_v48 = vpop.xlane.xlu0 %1581  ;;  %vm1857_vm2 = vcmp.ne.s32.totalorder %v3554_v55, 4294967295 }
 0x2c9   : > { %2696 = vpow2.f32 %v1627_v14  ;;  %v1612_v54 = vsub.f32 %v3327_v12, %v3496_v48  ;;  %v3513_v12 = vld [vmem:[%s3196_s23 + $0x8] sm:$0xff] }
 0x2ca   : > { %vm1854_vm14 = vcmp.ne.s32.totalorder %v3513_v12, 4294967295 }
 0x2cb   : > { %v1629_v20 = vmul.f32 1.442695, %v1612_v54 }
 0x2cc   : > { %v3500_v50 = vpop.xlane.xlu1 %1583 }
 0x2cd   : > { %2698 = vpow2.f32 %v1629_v20  ;;  %v1613_v36 = vsub.f32 %v3339_v25, %v3500_v50 }
 0x2cf   : > { %v1631_v51 = vmul.f32 1.442695, %v1613_v36 }
 0x2d0   : > { %v3504_v52 = vpop.xlane.xlu1 %1585 }
 0x2d1   : > { %2700 = vpow2.f32 %v1631_v51  ;;  %v1614_v3 = vsub.f32 %v3348_v49, %v3504_v52  ;;  %v2969_v49 = vmov 0.0  }
 0x2d2   : > { %v2318_v7 = vsel %vm1853_vm13, 1.0, %v2969_v49  ;;  %v2319_v9 = vsel %vm1854_vm14, 1.0, %v2969_v49  ;;  %v2320_v0 = vsel %vm1855_vm0, 1.0, %v2969_v49  ;;  %v2321_v45 = vsel %vm1856_vm1, 1.0, %v2969_v49 }
 0x2d3   : > { %v2697_v57 = vpop.eup %2696  ;;  %v1633_v58 = vmul.f32 1.442695, %v1614_v3  ;;  %v1971_v17 = vsel %vm1901_vm15, %v2318_v7, 0.0  ;;  %v1972_v18 = vsel %vm1901_vm15, %v2319_v9, 0.0  ;;  %v1974_v53 = vsel %vm1901_vm15, %v2320_v0, 0.0  ;;  %v3564_v3 = vld [vmem:[%s3196_s23 + $0x28] sm:$0xff] }
 0x2d4   : > { %1659 = vadd.xlane.f32.xlu1 %v2697_v57  ;;  %v3516_v25 = vpop.xlane.xlu0 %1587  ;;  %v1973_v46 = vadd.f32 %v1972_v18, %v1971_v17  ;;  %v1976_v54 = vsel %vm1901_vm15, %v2321_v45, 0.0  ;;  %v2322_v51 = vsel %vm1857_vm2, 1.0, %v2969_v49  ;;  %vm1858_vm3 = vcmp.ne.s32.totalorder %v3564_v3, 4294967295 }
 0x2d5   : > { %2702 = vpow2.f32 %v1633_v58  ;;  %v1615_v1 = vsub.f32 %v3360_v39, %v3516_v25  ;;  %v2323_v7 = vsel %vm1858_vm3, 1.0, %v2969_v49 }
 0x2d6   : > { %v1980_v18 = vsel %vm1901_vm15, %v2323_v7, 0.0 }
 0x2d7   : > { %v2699_v4 = vpop.eup %2698  ;;  %v1635_v10 = vmul.f32 1.442695, %v1615_v1  ;;  %v3526_v13 = vpop.xlane.xlu1 %1589 }
 0x2d8   : > { %v1616_v39 = vsub.f32 %v3366_v62, %v3526_v13  ;;  %1661 = vadd.xlane.f32.xlu0 %v2699_v4  ;;  %v1978_v4 = vsel %vm1901_vm15, %v2322_v51, 0.0 }
 0x2d9   : > { %2704 = vpow2.f32 %v1635_v10 }
 0x2da   : > { %v1637_v21 = vmul.f32 1.442695, %v1616_v39  ;;  %v3578_v39 = vld [vmem:[%s3196_s23 + $0x30] sm:$0xff] }
 0x2db   : > { %v2701_v22 = vpop.eup %2700  ;;  %vm1859_vm4 = vcmp.ne.s32.totalorder %v3578_v39, 4294967295 }
 0x2dc   : > { %2706 = vpow2.f32 %v1637_v21  ;;  %1663 = vadd.xlane.f32.xlu0 %v2701_v22  ;;  %v3543_v62 = vpop.xlane.xlu0 %1591  ;;  %v2324_v0 = vsel %vm1859_vm4, 1.0, %v2969_v49 }
 0x2dd   : > { %v1617_v38 = vsub.f32 %v3378_v19, %v3543_v62  ;;  %v1975_v19 = vadd.f32 %v1974_v53, %v1973_v46  ;;  %v3588_v46 = vld [vmem:[%s3196_s23 + $0x38] sm:$0xff]  ;;  %v1982_v45 = vsel %vm1901_vm15, %v2324_v0, 0.0 }
 0x2de   : > { %vm1860_vm5 = vcmp.ne.s32.totalorder %v3588_v46, 4294967295 }
 0x2df   : > { %v2703_v43 = vpop.eup %2702  ;;  %v1639_v47 = vmul.f32 1.442695, %v1617_v38  ;;  %v3551_v61 = vpop.xlane.xlu1 %1593 }
 0x2e0   : > { %v1618_v14 = vsub.f32 %v3385_v28, %v3551_v61  ;;  %1665 = vadd.xlane.f32.xlu1 %v2703_v43  ;;  %v1977_v28 = vadd.f32 %v1976_v54, %v1975_v19  ;;  %v3602_v54 = vld [vmem:[%s3196_s23 + $0x40] sm:$0xff] }
 0x2e1   : > { %2708 = vpow2.f32 %v1639_v47  ;;  %v2325_v47 = vsel %vm1860_vm5, 1.0, %v2969_v49  ;;  %vm1861_vm6 = vcmp.ne.s32.totalorder %v3602_v54, 4294967295 }
 0x2e2   : > { %v1641_v20 = vmul.f32 1.442695, %v1618_v14 }
 0x2e3   : > { %v2705_v36 = vpop.eup %2704 }
 0x2e4   : > { %2710 = vpow2.f32 %v1641_v20  ;;  %1667 = vadd.xlane.f32.xlu0 %v2705_v36  ;;  %v3567_v57 = vpop.xlane.xlu0 %1595  ;;  %v1984_v36 = vsel %vm1901_vm15, %v2325_v47, 0.0  ;;  %v3637_v47 = vld [vmem:[%s3196_s23 + $0x58] sm:$0xff] }
 0x2e5   : > { %v1619_v58 = vsub.f32 %v3397_v56, %v3567_v57  ;;  %v1979_v56 = vadd.f32 %v1978_v4, %v1977_v28  ;;  %vm3905_vm9 = vcmp.ne.s32.totalorder %v3637_v47, 4294967295 }
 0x2e6   : > { %v2707_v1 = vpop.eup %2706 }
 0x2e7   : > { %v1643_v9 = vmul.f32 1.442695, %v1619_v58  ;;  %v3575_v10 = vpop.xlane.xlu1 %1597  ;;  %1669 = vadd.xlane.f32.xlu1 %v2707_v1  ;;  %v2326_v58 = vsel %vm1861_vm6, 1.0, %v2969_v49  ;;  %v3612_v1 = vld [vmem:[%s3196_s23 + $0x48] sm:$0xff] }
 0x2e8   : > { %v1620_v17 = vsub.f32 %v3404_v6, %v3575_v10  ;;  %v1981_v6 = vadd.f32 %v1980_v18, %v1979_v56  ;;  %vm1862_vm7 = vcmp.ne.s32.totalorder %v3612_v1, 4294967295 }
 0x2e9   : > { %2712 = vpow2.f32 %v1643_v9  ;;  %v2327_v56 = vsel %vm1862_vm7, 1.0, %v2969_v49 }
 0x2ea   : > { %v1645_v21 = vmul.f32 1.442695, %v1620_v17  ;;  %v1986_v17 = vsel %vm1901_vm15, %v2326_v58, 0.0  ;;  %v3654_v58 = vld [vmem:[%s3196_s23 + $0x60] sm:$0xff] }
 0x2eb   : > { %v2709_v22 = vpop.eup %2708  ;;  %vm3906_vm10 = vcmp.ne.s32.totalorder %v3654_v58, 4294967295 }
 0x2ec   : > { %2714 = vpow2.f32 %v1645_v21  ;;  %1671 = vadd.xlane.f32.xlu0 %v2709_v22  ;;  %v3591_v38 = vpop.xlane.xlu0 %1599  ;;  %v3626_v22 = vld [vmem:[%s3196_s23 + $0x50] sm:$0xff] }
 0x2ed   : > { %v1621_v53 = vsub.f32 %v3416_v29, %v3591_v38  ;;  %v1983_v29 = vadd.f32 %v1982_v45, %v1981_v6  ;;  %vm1863_vm8 = vcmp.ne.s32.totalorder %v3626_v22, 4294967295  ;;  %v1988_v6 = vsel %vm1901_vm15, %v2327_v56, 0.0  ;;  %v3663_v56 = vld [vmem:[%s3196_s23 + $0x68] sm:$0xff]  ;;  %s3771_s23 = scalar_lea.sflag [#allocation9], %s2025_s17 }
 0x2ee   : > { %v2711_v43 = vpop.eup %2710  ;;  %v2328_v45 = vsel %vm1863_vm8, 1.0, %v2969_v49  ;;  %vm3907_vm11 = vcmp.ne.s32.totalorder %v3663_v56, 4294967295 }
 0x2ef   : > { %v1647_v14 = vmul.f32 1.442695, %v1621_v53  ;;  %v3599_v19 = vpop.xlane.xlu1 %1601  ;;  %1673 = vadd.xlane.f32.xlu1 %v2711_v43  ;;  %v1985_v7 = vadd.f32 %v1984_v36, %v1983_v29 }
 0x2f0   : > { %v1622_v20 = vsub.f32 %v3423_v42, %v3599_v19 }
 0x2f1   : > { %2716 = vpow2.f32 %v1647_v14 }
 0x2f2   : > { %v1649_v51 = vmul.f32 1.442695, %v1622_v20  ;;  %v1990_v20 = vsel %vm1901_vm15, %v2328_v45, 0.0 }
 0x2f3   : > { %v2713_v28 = vpop.eup %2712 }
 0x2f4   : > { %1675 = vadd.xlane.f32.xlu0 %v2713_v28  ;;  %v3615_v4 = vpop.xlane.xlu0 %1603  ;;  %2718 = vpow2.f32 %v1649_v51  ;;  %v2329_v51 = vsel %vm3905_vm9, 1.0, %v2969_v49  ;;  %vm3908_vm9 = vcmp.ne.s32.totalorder %v3472_v41, 4294967295 }
 0x2f5   : > { %v1623_v42 = vsub.f32 %v3436_v11, %v3615_v4  ;;  %v1987_v11 = vadd.f32 %v1986_v17, %v1985_v7  ;;  %v2330_v17 = vsel %vm3906_vm10, 1.0, %v2969_v49 }
 0x2f6   : > { %v2715_v9 = vpop.eup %2714 }
 0x2f7   : > { %v1651_v18 = vmul.f32 1.442695, %v1623_v42  ;;  %v3623_v21 = vpop.xlane.xlu1 %1605  ;;  %1677 = vadd.xlane.f32.xlu1 %v2715_v9  ;;  %v1992_v42 = vsel %vm1901_vm15, %v2329_v51, 0.0 }
 0x2f8   : > { %v1624_v0 = vsub.f32 %v3445_v24, %v3623_v21  ;;  %1831 = vadd.xlane.f32.xlu0 %v3368_v63  ;;  %v1989_v63 = vadd.f32 %v1988_v6, %v1987_v11 }
 0x2f9   : > { %2720 = vpow2.f32 %v1651_v18 }
 0x2fa   : > { %v1653_v53 = vmul.f32 1.442695, %v1624_v0  ;;  %v2331_v0 = vsel %vm3907_vm11, 1.0, %v2969_v49  ;;  %vm1802_vm11 = vcmp.eq.s32.totalorder %v3352_v33, %v3490_v32 }
 0x2fb   : > { %v2717_v43 = vpop.eup %2716 }
 0x2fc   : > { %1833 = vadd.xlane.f32.xlu0 %v3380_v23  ;;  %1679 = vadd.xlane.f32.xlu1 %v2717_v43  ;;  %v3641_v24 = vpop.xlane.xlu0 %1607  ;;  %2722 = vpow2.f32 %v1653_v53  ;;  %v1996_v53 = vsel %vm1901_vm15, %v2331_v0, 0.0  ;;  %v2332_v43 = vsel %vm1867_vm12, 1.0, %v2969_v49 }
 0x2fd   : > { %v1625_v14 = vsub.f32 %v3456_v37, %v3641_v24  ;;  %v1991_v37 = vadd.f32 %v1990_v20, %v1989_v63 }
 0x2fe   : > { %v3646_v29 = vpop.xlane.xlu1 %1609  ;;  %v2719_v36 = vpop.eup %2718 }
 0x2ff   : > { %v1655_v28 = vmul.f32 1.442695, %v1625_v14  ;;  %v1626_v23 = vsub.f32 %v3463_v34, %v3646_v29  ;;  %v1993_v34 = vadd.f32 %v1992_v42, %v1991_v37  ;;  %v2333_v14 = vsel %vm3908_vm9, 1.0, %v2969_v49 }
 0x300   : > { %1835 = vadd.xlane.f32.xlu0 %v3389_v30  ;;  %1681 = vadd.xlane.f32.xlu1 %v2719_v36  ;;  %v1994_v30 = vsel %vm1901_vm15, %v2330_v17, 0.0  ;;  %v2000_v51 = vsel %vm1901_vm15, %v2333_v14, 0.0  ;;  %v1818_v37 = vsel %vm1802_vm11, %v3433_v2, 0.0 }
 0x301   : > { %2724 = vpow2.f32 %v1655_v28  ;;  %v1657_v7 = vmul.f32 1.442695, %v1626_v23  ;;  %v1995_v11 = vadd.f32 %v1994_v30, %v1993_v34 }
 0x302   : > { %v1785_v6 = vpop.permute.xlu1 %1784 }
 0x303   : > { %v2721_v9 = vpop.eup %2720  ;;  %2726 = vpow2.f32 %v1657_v7  ;;  %vm1803_vm10 = vcmp.eq.s32.totalorder %v3352_v33, %v1785_v6  ;;  %v1997_v45 = vadd.f32 %v1996_v53, %v1995_v11 }
 0x304   : > { %1837 = vadd.xlane.f32.xlu0 %v3399_v59  ;;  %1683 = vadd.xlane.f32.xlu1 %v2721_v9  ;;  %v1819_v20 = vsel %vm1803_vm10, %v3450_v27, 0.0  ;;  %v1788_v23 = vpop.permute.xlu0 %1787 }
 0x305   : > { %vm1804_vm9 = vcmp.eq.s32.totalorder %v3352_v33, %v1788_v23 }
 0x306   : > { %v2723_v18 = vpop.eup %2722  ;;  %v1820_v49 = vsel %vm1804_vm9, %v3452_v31, 0.0 }
 0x308   : > { %1841 = vadd.xlane.f32.xlu0 %v3418_v35  ;;  %1685 = vadd.xlane.f32.xlu1 %v2723_v18  ;;  %v1998_v35 = vsel %vm1901_vm15, %v2332_v43, 0.0 }
 0x309   : > { %v1999_v36 = vadd.f32 %v1998_v35, %v1997_v45 }
 0x30b   : > { %v2725_v59 = vpop.eup %2724  ;;  %v2001_v28 = vadd.f32 %v2000_v51, %v1999_v36 }
 0x30c   : > { %1845 = vadd.xlane.f32.xlu0 %v3438_v16  ;;  %1687 = vadd.xlane.f32.xlu1 %v2725_v59 }
 0x30d   : > { %v2727_v63 = vpop.eup %2726  ;;  %v2002_v16 = vrot.slane %v2001_v28, 4 }
 0x30f   : > { %v2003_v27 = vadd.f32 %v2002_v16, %v2001_v28 }
 0x310   : > { %1849 = vadd.xlane.f32.xlu0 %v1819_v20  ;;  %1689 = vadd.xlane.f32.xlu1 %v2727_v63 }
 0x311   : > { %v2004_v7 = vrot.slane %v2003_v27, 2 }
 0x313   : > { %v2005_v42 = vadd.f32 %v2004_v7, %v2003_v27 }
 0x314   : > { %1839 = vadd.xlane.f32.xlu1 %v3408_v8 }
 0x315   : > { %v2006_v8 = vrot.slane %v2005_v42, 1 }
 0x317   : > { %v2007_v9 = vadd.f32 %v2006_v8, %v2005_v42 }
 0x318   : > { %1843 = vadd.xlane.f32.xlu1 %v3427_v44 }
 0x31c   : > { %1847 = vadd.xlane.f32.xlu1 %v1818_v37 }
 0x320   : > { %1851 = vadd.xlane.f32.xlu1 %v1820_v49 }
 0x331   : > { %2016 = vperm.xlu1 %2615, %v2007_v9   ;;  %v1824_v17 = vpop.xlane.xlu0 %1823 }
 0x333   : > { %v1822_v2 = vpop.xlane.xlu1 %1821 }
 0x335   : > { %v1826_v32 = vpop.xlane.xlu0 %1825 }
 0x339   : > { %v3693_v34 = vpop.xlane.xlu0 %1827 }
 0x33d   : > { %v3695_v44 = vpop.xlane.xlu0 %1829 }
 0x361   : > { %v1660_v18 = vpop.xlane.xlu1 %1659 }
 0x365   : > { %v1662_v30 = vpop.xlane.xlu0 %1661 }
 0x366   : > { %2728 = vlog2.f32 %v1662_v30 }
 0x367   : > { %2730 = vlog2.f32 %v1660_v18 }
 0x369   : > { %v1664_v33 = vpop.xlane.xlu0 %1663 }
 0x36a   : > { %2732 = vlog2.f32 %v1664_v33 }
 0x36d   : > { %v1666_v31 = vpop.xlane.xlu1 %1665 }
 0x36e   : > { %2734 = vlog2.f32 %v1666_v31 }
 0x370   : > { %v2729_v53 = vpop.eup %2728 }
 0x371   : > { %v1668_v0 = vpop.xlane.xlu0 %1667  ;;  %v2731_v59 = vpop.eup %2730  ;;  %v1694_v35 = vmul.f32 0.6931472, %v2729_v53 }
 0x372   : > { %2736 = vlog2.f32 %v1668_v0  ;;  %v1692_v14 = vmul.f32 0.6931472, %v2731_v59 }
 0x373   : > { %v1724_v28 = vadd.f32 %v1694_v35, %v3496_v48 }
 0x374   : > { %v1670_v11 = vpop.xlane.xlu1 %1669  ;;  %v2733_v45 = vpop.eup %2732  ;;  %v1723_v37 = vadd.f32 %v1692_v14, %v3492_v5 }
 0x375   : > { %2738 = vlog2.f32 %v1670_v11  ;;  %v1696_v36 = vmul.f32 0.6931472, %v2733_v45  ;;  %v1870_v8 = vsub.f32 %v1724_v28, %v1824_v17 }
 0x376   : > { %v1869_v33 = vsub.f32 %v1723_v37, %v1822_v2 }
 0x377   : > { %v1725_v49 = vadd.f32 %v1696_v36, %v3500_v50  ;;  %v1886_v5 = vsel %vm1854_vm14, %v1870_v8, 0.0  ;;  %vm3927_vm14 = vcmp.ne.s32.totalorder %v3637_v47, 4294967295 }
 0x378   : > { %v2735_v20 = vpop.eup %2734  ;;  %v1885_v17 = vsel %vm1853_vm13, %v1869_v33, 0.0  ;;  %v1903_v2 = vsel %vm1901_vm15, %v1886_v5, 0.0  ;;  %vm3926_vm13 = vcmp.ne.s32.totalorder %v3654_v58, 4294967295 }
 0x379   : > { %v1672_v6 = vpop.xlane.xlu0 %1671  ;;  %v1698_v27 = vmul.f32 0.6931472, %v2735_v20  ;;  %v1871_v0 = vsub.f32 %v1725_v49, %v1826_v32  ;;  %v1902_v60 = vsel %vm1901_vm15, %v1885_v17, 0.0 }
 0x37a   : > { %2740 = vlog2.f32 %v1672_v6 }
 0x37b   : > { %v1726_v31 = vadd.f32 %v1698_v27, %v3504_v52  ;;  %v1887_v52 = vsel %vm1855_vm0, %v1871_v0, 0.0  ;;  %vm3928_vm0 = vcmp.ne.s32.totalorder %v3663_v56, 4294967295 }
 0x37c   : > { %v1674_v43 = vpop.xlane.xlu1 %1673  ;;  %v2737_v51 = vpop.eup %2736 }
 0x37d   : > { %2742 = vlog2.f32 %v1674_v43  ;;  %v1700_v7 = vmul.f32 0.6931472, %v2737_v51  ;;  %v1872_v43 = vsub.f32 %v1726_v31, %v3693_v34  ;;  %v1905_v34 = vsel %vm1901_vm15, %v1887_v52, 0.0 }
 0x37f   : > { %v2739_v42 = vpop.eup %2738  ;;  %v1727_v48 = vadd.f32 %v1700_v7, %v3516_v25  ;;  %v1888_v20 = vsel %vm1856_vm1, %v1872_v43, 0.0  ;;  %vm3929_vm1 = vcmp.ne.s32.totalorder %v3472_v41, 4294967295 }
 0x380   : > { %v1702_v6 = vmul.f32 0.6931472, %v2739_v42  ;;  %v1907_v27 = vsel %vm1901_vm15, %v1888_v20, 0.0 }
 0x381   : > { %v1676_v63 = vpop.xlane.xlu0 %1675  ;;  %v1873_v25 = vsub.f32 %v1727_v48, %v3695_v44  ;;  %v1904_v44 = vadd.f32 %v1903_v2, %v1902_v60 }
 0x382   : > { %2744 = vlog2.f32 %v1676_v63  ;;  %v1728_v35 = vadd.f32 %v1702_v6, %v3526_v13 }
 0x383   : > { %v1889_v51 = vsel %vm1857_vm2, %v1873_v25, 0.0  ;;  %v1906_v37 = vadd.f32 %v1905_v34, %v1904_v44 }
 0x384   : > { %v1678_v16 = vpop.xlane.xlu1 %1677  ;;  %v2741_v30 = vpop.eup %2740  ;;  %v1909_v42 = vsel %vm1901_vm15, %v1889_v51, 0.0 }
 0x385   : > { %v1832_v23 = vpop.xlane.xlu0 %1831  ;;  %v1704_v53 = vmul.f32 0.6931472, %v2741_v30  ;;  %v1908_v8 = vadd.f32 %v1907_v27, %v1906_v37 }
 0x386   : > { %v1874_v15 = vsub.f32 %v1728_v35, %v1832_v23 }
 0x387   : > { %v2743_v11 = vpop.eup %2742  ;;  %v1729_v63 = vadd.f32 %v1704_v53, %v3543_v62 }
 0x388   : > { %v1706_v12 = vmul.f32 0.6931472, %v2743_v11  ;;  %v1890_v26 = vsel %vm1858_vm3, %v1874_v15, 0.0 }
 0x389   : > { %v1680_v9 = vpop.xlane.xlu1 %1679  ;;  %v1834_v18 = vpop.xlane.xlu0 %1833  ;;  %v1911_v30 = vsel %vm1901_vm15, %v1890_v26, 0.0 }
 0x38a   : > { %2746 = vlog2.f32 %v1680_v9  ;;  %v1875_v28 = vsub.f32 %v1729_v63, %v1834_v18  ;;  %v1730_v13 = vadd.f32 %v1706_v12, %v3551_v61  ;;  %v1910_v18 = vadd.f32 %v1909_v42, %v1908_v8 }
 0x38b   : > { %2748 = vlog2.f32 %v1678_v16 }
 0x38c   : > { %v2745_v59 = vpop.eup %2744  ;;  %v1891_v61 = vsel %vm1859_vm4, %v1875_v28, 0.0  ;;  %v1912_v6 = vadd.f32 %v1911_v30, %v1910_v18 }
 0x38d   : > { %v1682_v50 = vpop.xlane.xlu1 %1681  ;;  %v1836_v32 = vpop.xlane.xlu0 %1835  ;;  %v1708_v45 = vmul.f32 0.6931472, %v2745_v59  ;;  %v1913_v48 = vsel %vm1901_vm15, %v1891_v61, 0.0 }
 0x38e   : > { %v1876_v7 = vsub.f32 %v1730_v13, %v1836_v32  ;;  %v1914_v17 = vadd.f32 %v1913_v48, %v1912_v6 }
 0x38f   : > { %v1731_v62 = vadd.f32 %v1708_v45, %v3567_v57 }
 0x390   : > { %v1892_v3 = vsel %vm1860_vm5, %v1876_v7, 0.0 }
 0x391   : > { %v1684_v14 = vpop.xlane.xlu1 %1683  ;;  %v1838_v49 = vpop.xlane.xlu0 %1837  ;;  %v1915_v59 = vsel %vm1901_vm15, %v1892_v3, 0.0 }
 0x392   : > { %2750 = vlog2.f32 %v1684_v14  ;;  %v1877_v9 = vsub.f32 %v1731_v62, %v1838_v49  ;;  %v1916_v32 = vadd.f32 %v1915_v59, %v1914_v17 }
 0x393   : > { %2752 = vlog2.f32 %v1682_v50 }
 0x394   : > { %v2747_v36 = vpop.eup %2746  ;;  %v1893_v53 = vsel %vm1861_vm6, %v1877_v9, 0.0 }
 0x395   : > { %v1686_v16 = vpop.xlane.xlu1 %1685  ;;  %v1712_v23 = vmul.f32 0.6931472, %v2747_v36  ;;  %v2749_v55 = vpop.eup %2748 }
 0x396   : > { %2754 = vlog2.f32 %v1686_v16  ;;  %v1710_v0 = vmul.f32 0.6931472, %v2749_v55  ;;  %v1842_v11 = vpop.xlane.xlu0 %1841 }
 0x397   : > { %v1733_v33 = vadd.f32 %v1712_v23, %v3591_v38  ;;  %v1917_v38 = vsel %vm1901_vm15, %v1893_v53, 0.0 }
 0x398   : > { %v1732_v52 = vadd.f32 %v1710_v0, %v3575_v10  ;;  %v1918_v54 = vadd.f32 %v1917_v38, %v1916_v32 }
 0x399   : > { %v1688_v57 = vpop.xlane.xlu1 %1687  ;;  %v1879_v46 = vsub.f32 %v1733_v33, %v1842_v11 }
 0x39a   : > { %2756 = vlog2.f32 %v1688_v57  ;;  %v1846_v45 = vpop.xlane.xlu0 %1845 }
 0x39b   : > { %v1895_v63 = vsel %vm1863_vm8, %v1879_v46, 0.0 }
 0x39c   : > { %v2751_v31 = vpop.eup %2750  ;;  %v1921_v28 = vsel %vm1901_vm15, %v1895_v63, 0.0 }
 0x39d   : > { %v2753_v5 = vpop.eup %2752  ;;  %v1716_v39 = vmul.f32 0.6931472, %v2751_v31  ;;  %v1690_v50 = vpop.xlane.xlu1 %1689 }
 0x39e   : > { %2758 = vlog2.f32 %v1690_v50  ;;  %v1714_v43 = vmul.f32 0.6931472, %v2753_v5  ;;  %v1850_v16 = vpop.xlane.xlu0 %1849 }
 0x39f   : > { %v1735_v2 = vadd.f32 %v1716_v39, %v3615_v4 }
 0x3a0   : > { %v2755_v25 = vpop.eup %2754  ;;  %v1734_v15 = vadd.f32 %v1714_v43, %v3599_v19 }
 0x3a1   : > { %v1840_v12 = vpop.xlane.xlu1 %1839  ;;  %v1718_v60 = vmul.f32 0.6931472, %v2755_v25  ;;  %v1881_v34 = vsub.f32 %v1735_v2, %v1846_v45 }
 0x3a2   : > { %v1878_v35 = vsub.f32 %v1732_v52, %v1840_v12 }
 0x3a3   : > { %v1897_v62 = vsel %vm3926_vm13, %v1881_v34, 0.0  ;;  %v1736_v19 = vadd.f32 %v1718_v60, %v3623_v21 }
 0x3a4   : > { %v2757_v14 = vpop.eup %2756  ;;  %v1894_v20 = vsel %vm1862_vm7, %v1878_v35, 0.0 }
 0x3a5   : > { %v1720_v4 = vmul.f32 0.6931472, %v2757_v14  ;;  %v1919_v10 = vsel %vm1901_vm15, %v1894_v20, 0.0  ;;  %v1844_v36 = vpop.xlane.xlu1 %1843 }
 0x3a6   : > { %v1920_v44 = vadd.f32 %v1919_v10, %v1918_v54  ;;  %v1880_v51 = vsub.f32 %v1734_v15, %v1844_v36 }
 0x3a7   : > { %v1737_v13 = vadd.f32 %v1720_v4, %v3641_v24  ;;  %v1925_v24 = vsel %vm1901_vm15, %v1897_v62, 0.0 }
 0x3a8   : > { %v2759_v22 = vpop.eup %2758  ;;  %v1896_v1 = vsel %vm3927_vm14, %v1880_v51, 0.0  ;;  %v1922_v37 = vadd.f32 %v1921_v28, %v1920_v44 }
 0x3a9   : > { %v1722_v27 = vmul.f32 0.6931472, %v2759_v22  ;;  %v1883_v49 = vsub.f32 %v1737_v13, %v1850_v16  ;;  %v1923_v26 = vsel %vm1901_vm15, %v1896_v1, 0.0  ;;  %v1848_v23 = vpop.xlane.xlu1 %1847 }
 0x3aa   : > { %v1924_v7 = vadd.f32 %v1923_v26, %v1922_v37  ;;  %v1882_v42 = vsub.f32 %v1736_v19, %v1848_v23 }
 0x3ab   : > { %v1738_v58 = vadd.f32 %v1722_v27, %v3646_v29  ;;  %v1899_v47 = vsel %vm1867_vm12, %v1883_v49, 0.0 }
 0x3ac   : > { %v1898_v55 = vsel %vm3928_vm0, %v1882_v42, 0.0  ;;  %v1926_v21 = vadd.f32 %v1925_v24, %v1924_v7  ;;  %v1929_v30 = vsel %vm1901_vm15, %v1899_v47, 0.0 }
 0x3ad   : > { %v1927_v8 = vsel %vm1901_vm15, %v1898_v55, 0.0  ;;  %v1852_v61 = vpop.xlane.xlu1 %1851 }
 0x3ae   : > { %v1928_v9 = vadd.f32 %v1927_v8, %v1926_v21  ;;  %v1884_v57 = vsub.f32 %v1738_v58, %v1852_v61 }
 0x3b0   : > { %v1900_v18 = vsel %vm3929_vm1, %v1884_v57, 0.0  ;;  %v1930_v29 = vadd.f32 %v1929_v30, %v1928_v9 }
 0x3b1   : > { %v1931_v40 = vsel %vm1901_vm15, %v1900_v18, 0.0  ;;  %v2017_v56 = vpop.permute.xlu1 %2016 }
 0x3b2   : > { %v1932_v3 = vadd.f32 %v1931_v40, %v1930_v29  ;;  %2019 = vst [vmem:[%s3909_s16] sm:$0x1] %v2017_v56 }
 0x3b4   : > { %v1933_v33 = vrot.slane %v1932_v3, 4 }
 0x3b6   : > { %v1934_v31 = vadd.f32 %v1933_v33, %v1932_v3 }
 0x3b8   : > { %v1935_v0 = vrot.slane %v1934_v31, 2 }
 0x3ba   : > { %v1936_v48 = vadd.f32 %v1935_v0, %v1934_v31 }
 0x3bc   : > { %v1937_v11 = vrot.slane %v1936_v48, 1 }
 0x3be   : > { %v1938_v5 = vadd.f32 %v1937_v11, %v1936_v48 }
 0x3c0   : > { %2010 = vperm.xlu0 %2614, %v1938_v5  }
 0x43a   : > { %2035 = sbr.rel (!%p3930_p1) target bundleno = 1117 (0x45d), region = 60 }
 0x43f   : > { %v2011_v41 = vpop.permute.xlu0 %2010 }
 0x440   : > { %2013 = vst [vmem:[%s394_s22] sm:$0x1] %v2011_v41 }
 0x441   : > { %s3941_s11 = smov (!%p2038_p2, %s2037_s11), 16 }
 0x442   : > { %s3776_s15 = sshll.u32 %s3941_s11, 6 }
 0x443   : > { %s2042_s18 = ssub.s32 1024, %s3776_s15 }
 0x444   : > { %2043 = vsyncadd %s2021_s25, %s2042_s18  ;;  %p2337_p3 = scmp.ne.s32.totalorder %s3776_s15, 0  ;;  %s2361_s27 = sshll.u32 %s3046_s13, 10 }
 0x445   : > { %s3786_s14 = scalar_lea.hbm %s3895_s7, %s2361_s27  ;;  %s2048_s17 = sshll.u32 %s3329_s29, 4  ;;  %s3789_s17 = int_to_ptr.vmem [resolvable:$true] %s2048_s17 }
 0x446   : > { %s2830_s11 = scalar_lea.vmem %s3789_s17, %s3776_s15  ;;  %s2970_s18 = smov [#allocation7]  }
 0x447   : > { %p2831_p4 = scmp.ne.s32.totalorder %s3789_s17, %s2830_s11  ;;  %s2834_s16 = sshll.u32 %s2970_s18, 4  ;;  %s2835_s16 = int_to_ptr.vmem [resolvable:$false] %s2834_s16 }
 0x448   : > { %s2836_s13 = scalar_lea.vmem %s2835_s16, 2048  ;;  %p2837_p11 = scmp.lt.s32.totalorder %s3789_s17, %s2835_s16 }
 0x449   : > { %p2832_p7 = pnand %p2831_p4, %p2337_p3  ;;  %p2838_p13 = scmp.lt.s32.totalorder %s2836_s13, %s2830_s11 }
 0x44b   : > { %p2833_p8 = pneg %p2832_p7  ;;  %p2839_p0 = por %p2838_p13, %p2837_p11 }
 0x44d   : > { %p2840_p5 = pnand %p2839_p0, %p2833_p8 }
 0x44f   : > { %2843 = shalt.err (!%p2840_p5)
}
 0x450   : > { %s2844_s29 = scalar_lea.hbm %s3786_s14, %s3776_s15  ;;  %s2848_s28 = scalar_lea.hbm %s3895_s7, 2432 }
 0x451   : > { %p2845_p6 = scmp.ne.s32.totalorder %s3786_s14, %s2844_s29  ;;  %p2849_p10 = scmp.lt.u32.totalorder %s3786_s14, %s3895_s7 }
 0x452   : > { %p2850_p1 = scmp.lt.u32.totalorder %s2848_s28, %s2844_s29  ;;  %p2852_p4 = scmp.lt.u32.totalorder %s2844_s29, %s3786_s14 }
 0x453   : > { %p2846_p9 = pnand %p2845_p6, %p2337_p3 }
 0x454   : > { %p2851_p2 = por %p2850_p1, %p2849_p10 }
 0x455   : > { %p2847_p12 = pneg %p2846_p9 }
 0x456   : > { %p2853_p7 = por %p2852_p4, %p2851_p2 }
 0x458   : > { %p2854_p8 = pnand %p2853_p7, %p2847_p12 }
 0x45a   : > { %2857 = shalt.err (!%p2854_p8)
}
 0x45b   : > { %s2971_s18 = smov 64   ;;  %s2972_s13 = smov 4  }
 0x45c   : > { %2054 = dma.vmem_to_hbm [thread:$0]  (%p2337_p3), %s3789_s17, %s3776_s15, %s3786_s14, %s2021_s25, %s2971_s18, %s2971_s18, %s2972_s13  }
 0x45d PF: > { %s3821_s29 = scalar_lea.hbm %s3896_s8, %s3152_s21  ;;  %s2064_s28 = sshll.u32 %s394_s22, 4  ;;  %s2065_s28 = int_to_ptr.vmem [resolvable:$true] %s2064_s28 }
 0x45e   : > { %s3829_s0 = scalar_lea.hbm %s3897_s9, %s3152_s21  ;;  %s2858_s1 = scalar_lea.vmem %s2065_s28, 16 }
 0x45f   : > { %p2859_p3 = scmp.ne.s32.totalorder %s2065_s28, %s2858_s1  ;;  %p3931_p11 = scmp.ne.s32.totalorder %s3915_s19, 0 }
 0x460   : > { %s2973_s25 = smov [#allocation8]  }
 0x461   : > { %p2860_p13 = pnand %p2859_p3, %p3931_p11  ;;  %s2862_s15 = sshll.u32 %s2973_s25, 4  ;;  %s2863_s15 = int_to_ptr.vmem [resolvable:$false] %s2862_s15 }
 0x462   : > { %s2864_s14 = scalar_lea.vmem %s2863_s15, 32  ;;  %p2865_p5 = scmp.lt.s32.totalorder %s2065_s28, %s2863_s15 }
 0x463   : > { %p2861_p0 = pneg %p2860_p13  ;;  %p2866_p6 = scmp.lt.s32.totalorder %s2864_s14, %s2858_s1 }
 0x465   : > { %p2867_p9 = por %p2866_p6, %p2865_p5 }
 0x467   : > { %p2868_p12 = pnand %p2867_p9, %p2861_p0 }
 0x469   : > { %2871 = shalt.err (!%p2868_p12)
}
 0x46a   : > { %s2872_s21 = scalar_lea.hbm %s3821_s29, 16  ;;  %s2876_s18 = scalar_lea.hbm %s3896_s8, 48 }
 0x46b   : > { %p2873_p10 = scmp.ne.s32.totalorder %s3821_s29, %s2872_s21  ;;  %p2877_p4 = scmp.lt.u32.totalorder %s3821_s29, %s3896_s8 }
 0x46c   : > { %p2878_p7 = scmp.lt.u32.totalorder %s2876_s18, %s2872_s21  ;;  %p2880_p3 = scmp.lt.u32.totalorder %s2872_s21, %s3821_s29 }
 0x46d   : > { %p2874_p1 = pnand %p2873_p10, %p3931_p11 }
 0x46e   : > { %p2879_p8 = por %p2878_p7, %p2877_p4 }
 0x46f   : > { %p2875_p2 = pneg %p2874_p1 }
 0x470   : > { %p2881_p13 = por %p2880_p3, %p2879_p8 }
 0x472   : > { %p2882_p0 = pnand %p2881_p13, %p2875_p2 }
 0x474   : > { %2885 = shalt.err (!%p2882_p0)
}
 0x475   : > { %2545 = dma.vmem_to_hbm [thread:$0]  (%p3931_p11), %s2065_s28, 16, %s3821_s29, %s3771_s23  }
 0x476   : > { %s3932_s1 = scalar_lea.vmem [#allocation10], %s3301_s24  ;;  %s2974_s11 = smov [#allocation10]  }
 0x477   : > { %s2077_s26 = sshll.u32 %s3932_s1, 4  ;;  %s2890_s25 = sshll.u32 %s2974_s11, 4  ;;  %s2078_s26 = int_to_ptr.vmem [resolvable:$true] %s2077_s26  ;;  %s2891_s25 = int_to_ptr.vmem [resolvable:$false] %s2890_s25 }
 0x478   : > { %s2886_s16 = scalar_lea.vmem %s2078_s26, 16  ;;  %s2892_s15 = scalar_lea.vmem %s2891_s25, 32 }
 0x479   : > { %p2887_p5 = scmp.ne.s32.totalorder %s2078_s26, %s2886_s16  ;;  %p2893_p12 = scmp.lt.s32.totalorder %s2078_s26, %s2891_s25 }
 0x47a   : > { %p2894_p10 = scmp.lt.s32.totalorder %s2892_s15, %s2886_s16 }
 0x47b   : > { %p2888_p6 = pnand %p2887_p5, %p3931_p11 }
 0x47c   : > { %p2895_p1 = por %p2894_p10, %p2893_p12 }
 0x47d   : > { %p2889_p9 = pneg %p2888_p6 }
 0x47f   : > { %p2896_p2 = pnand %p2895_p1, %p2889_p9 }
 0x481   : > { %2899 = shalt.err (!%p2896_p2)
}
 0x482   : > { %s2900_s24 = scalar_lea.hbm %s3829_s0, 16  ;;  %s2904_s14 = scalar_lea.hbm %s3897_s9, 48 }
 0x483   : > { %p2901_p4 = scmp.ne.s32.totalorder %s3829_s0, %s2900_s24  ;;  %p2905_p3 = scmp.lt.u32.totalorder %s3829_s0, %s3897_s9 }
 0x484   : > { %p2906_p13 = scmp.lt.u32.totalorder %s2904_s14, %s2900_s24  ;;  %p2908_p5 = scmp.lt.u32.totalorder %s2900_s24, %s3829_s0 }
 0x485   : > { %p2902_p7 = pnand %p2901_p4, %p3931_p11 }
 0x486   : > { %p2907_p0 = por %p2906_p13, %p2905_p3 }
 0x487   : > { %p2903_p8 = pneg %p2902_p7 }
 0x488   : > { %p2909_p6 = por %p2908_p5, %p2907_p0 }
 0x48a   : > { %p2910_p9 = pnand %p2909_p6, %p2903_p8 }
 0x48c   : > { %2913 = shalt.err (!%p2910_p9)
}
 0x48d   : > { %2546 = dma.vmem_to_hbm [thread:$0]  (%p3931_p11), %s2078_s26, 16, %s3829_s0, %s3771_s23  }
 0x48e PF: > { %p2571_p12 = scmp.ge.s32.totalorder %s2960_s12, 2  ;;  %s2089_s17 = sand.u32 1, %s2948_s30  }
 0x48f   : > { %p3933_p10 = scmp.ne.s32.totalorder %s3916_s20, 0  ;;  %s2090_s18 = scalar_lea.sflag [#allocation4], %s2089_s17 }
 0x491   : > { %p2558_p1 = pnand %p2571_p12, %p3933_p10 }
 0x493   : > { %2939 = dma.done.wait (!%p2558_p1), %s2090_s18, 1024  }
 0x494   : > { %2941 = vsyncadd (!%p2558_p1), %s2090_s18, 4294966272  ;;  %s3934_s13 = sadd.s32 4294967294, %s2960_s12  }
 0x495   : > { %s2098_s27 = sand.u32 1, %s3934_s13  }
 0x496   : > { %s2099_s1 = scalar_lea.sflag [#allocation9], %s2098_s27 }
 0x497   : > { %2943 = dma.done.wait (!%p2558_p1), %s2099_s1, 32  }
 0x498   : > { %2945 = vsyncadd (!%p2558_p1), %s2099_s1, 4294967264  ;;  %s3935_s12 = sld [smem:[#allocation16_spill]]  ;;  %s3936_s0 = sld [smem:[#allocation15_spill]] }
 0x499   : > { %s3937_s11 = sld [smem:[#allocation17_spill]]  ;;  %s3938_s30 = smov %s2952_s10 }
 0x49e   : > { %p25_p11 = scmp.ge.s32.totalorder %s3935_s12, 5   ;;  %s3939_s10 = smov %s3936_s0 }
 0x4a0   :  { %27 = sbr.rel (!%p25_p11) target bundleno = 10 (0xa), region = 127 }
 0x4a7   :  { %2111 = vsyncpa [#allocation3], 1 }
 0x4a8   :  { %2113 = vsyncpa [#allocation3 + $0x1], 1 }
 0x4a9   :  { %2114 = vsyncpa [#allocation6], 1 }
 0x4aa   :  { %2115 = vsyncpa [#allocation4], 1 }
 0x4ab   :  { %2117 = vsyncpa [#allocation4 + $0x1], 1 }
 0x4ac   :  { %2118 = vsyncpa [#allocation9], 1 }
 0x4ad   :  { %2120 = vsyncpa [#allocation9 + $0x1], 1 }

</bundles_post_ra>
